<compile_context>
chip_gen: v7x
topology: tpu7x:2x2x1
jax: 0.10.0
libtpu: 0.0.40
codegen_flags: <defaults>
</compile_context>

<pallas_src>
import jax
import jax.numpy as jnp
from jax.experimental import pallas as pl
from jax.experimental.pallas import tpu as pltpu


POOL_K = 5  # AvgPool1d(kernel_size=5, stride=2)
POOL_S = 2


def _active_ben(x):
    # Piecewise activation from the reference:
    #   x <= -1      -> x + 1/3
    #   -1 < x < 1   -> x * (x^2 + 3) / 6
    #   x >= 1       -> x - 1/3
    cubic = x * (x * x + 3.0) * (1.0 / 6.0)
    return jnp.where(x <= -1.0, x + (1.0 / 3.0),
                     jnp.where(x >= 1.0, x - (1.0 / 3.0), cubic))


def _inception_aux_kernel(x_ref, wc_ref, shift_ref, w1_ref, b1_ref,
                          w2_ref, b2_ref, out_ref):
    # x_ref: (TN, C_in*L) in the input's native dtype, channels*length lane-dense.
    x = x_ref[...].astype(jnp.bfloat16)

    # AvgPool + 1x1 Conv + conv bias + eval BatchNorm folded into one MXU matmul + add.
    z = jnp.dot(x, wc_ref[...], preferred_element_type=jnp.float32) + shift_ref[...]
    z = _active_ben(z)                                   # f32 epilogue (v5e-safe)

    # fc1 + ActiveBen
    h = jnp.dot(z.astype(jnp.bfloat16), w1_ref[...],
                preferred_element_type=jnp.float32) + b1_ref[...]
    h = _active_ben(h)

    # Dropout(p=0.7) is identity in eval mode.

    # fc2 (weights/bias zero-padded to a lane-dense class count)
    y = jnp.dot(h.astype(jnp.bfloat16), w2_ref[...],
                preferred_element_type=jnp.float32) + b2_ref[...]
    out_ref[...] = y.astype(out_ref.dtype)


def _round_up(a, b):
    return (a + b - 1) // b * b


def inception_aux_1d(x, params, *, num_classes, bn_eps=1e-5, tile_n=512):
    """x: (N, C_in, L) float array.  Returns (N, num_classes) float32."""
    N, C_in, L = x.shape
    assert L >= POOL_K, "AvgPool1d(kernel=5) needs L >= 5"
    L_out = (L - POOL_K) // POOL_S + 1
    assert L_out == 1, "fc1 expects 512 features, so the pooled length must be 1"

    conv_w = params["conv_w"].astype(jnp.float32)      # (512, C_in, 1)
    conv_b = params["conv_b"].astype(jnp.float32)      # (512,)
    gamma = params["bn_gamma"].astype(jnp.float32)     # (512,)
    beta = params["bn_beta"].astype(jnp.float32)       # (512,)
    rmean = params["bn_mean"].astype(jnp.float32)      # (512,)
    rvar = params["bn_var"].astype(jnp.float32)        # (512,)
    fc1_w = params["fc1_w"].astype(jnp.float32)        # (512, 512)
    fc1_b = params["fc1_b"].astype(jnp.float32)        # (512,)
    fc2_w = params["fc2_w"].astype(jnp.float32)        # (num_classes, 512)
    fc2_b = params["fc2_b"].astype(jnp.float32)        # (num_classes,)

    hidden = conv_w.shape[0]                           # 512

    # Fold eval-mode BatchNorm into scale/shift (computed once in the wrapper).
    inv_std = jax.lax.rsqrt(rvar + bn_eps)
    bn_scale = gamma * inv_std                         # (512,)
    bn_shift = beta - rmean * bn_scale                 # (512,)

    # Fold AvgPool (mean over window [0:5)), conv bias and BN into one weight + shift:
    #   x2d[n, c*L + l]  (row-major reshape of x, no transpose)
    #   wc_fold[c*L + l, o] = conv_w[o, c] * bn_scale[o] / 5   for l < POOL_K, else 0
    w_co = jnp.transpose(conv_w[:, :, 0]) * bn_scale[None, :]          # (C_in, 512)
    wc_fold = jnp.zeros((C_in, L, hidden), jnp.float32)
    wc_fold = wc_fold.at[:, :POOL_K, :].set(w_co[:, None, :] * (1.0 / POOL_K))
    wc_fold = wc_fold.reshape(C_in * L, hidden).astype(jnp.bfloat16)   # (C_in*L, 512)
    shift = (conv_b * bn_scale + bn_shift).reshape(1, hidden)          # f32

    w1t = jnp.transpose(fc1_w).astype(jnp.bfloat16)    # (512, 512) bf16
    b1 = fc1_b.reshape(1, hidden)                      # f32

    # Pad classes to a multiple of 128 lanes for unmasked, lane-dense output stores.
    nc_pad = _round_up(num_classes, 128)
    w2t = (jnp.zeros((hidden, nc_pad), jnp.float32)
           .at[:, :num_classes].set(jnp.transpose(fc2_w)).astype(jnp.bfloat16))
    b2 = jnp.zeros((1, nc_pad), jnp.float32).at[:, :num_classes].set(fc2_b)

    # 2-D lane-dense input in its NATIVE dtype: (N, C_in*L) via row-major reshape.
    x2d = x.reshape(N, C_in * L)

    # Batch tile: big enough to amortize per-step pipeline overhead, but keep
    # >= 2 grid steps whenever possible so "parallel" shards over v7x's 2 TCs.
    n_pad8 = _round_up(N, 8)
    if n_pad8 > 8:
        tn = min(tile_n, _round_up(pl.cdiv(n_pad8, 2), 8))
    else:
        tn = n_pad8
    n_pad = _round_up(N, tn)
    if n_pad != N:
        x2d = jnp.pad(x2d, ((0, n_pad - N), (0, 0)))

    grid = (n_pad // tn,)

    out = pl.pallas_call(
        _inception_aux_kernel,
        out_shape=jax.ShapeDtypeStruct((n_pad, nc_pad), jnp.float32),
        grid=grid,
        in_specs=[
            pl.BlockSpec((tn, C_in * L), lambda i: (i, 0)),        # x tile (native dtype)
            pl.BlockSpec((C_in * L, hidden), lambda i: (0, 0)),    # folded pool+conv+BN weight
            pl.BlockSpec((1, hidden), lambda i: (0, 0)),           # folded shift
            pl.BlockSpec((hidden, hidden), lambda i: (0, 0)),      # fc1 weight^T (bf16)
            pl.BlockSpec((1, hidden), lambda i: (0, 0)),           # fc1 bias
            pl.BlockSpec((hidden, nc_pad), lambda i: (0, 0)),      # fc2 weight^T (bf16, padded)
            pl.BlockSpec((1, nc_pad), lambda i: (0, 0)),           # fc2 bias (padded)
        ],
        out_specs=pl.BlockSpec((tn, nc_pad), lambda i: (i, 0)),
        compiler_params=pltpu.CompilerParams(
            dimension_semantics=("parallel",)),
    )(x2d, wc_fold, shift, w1t, b1, w2t, b2)

    return out[:N, :num_classes]


def _reference(x, params, *, num_classes, bn_eps=1e-5):
    """Pure-JAX eval-mode reference of InceptionAux_1D.forward (all f32)."""
    N, C_in, L = x.shape
    L_out = (L - POOL_K) // POOL_S + 1
    pooled = jnp.stack(
        [x[:, :, i * POOL_S:i * POOL_S + POOL_K].mean(axis=2) for i in range(L_out)],
        axis=2)                                                        # (N, C_in, L_out)
    z = jnp.einsum("ncl,oc->nol", pooled, params["conv_w"][:, :, 0])
    z = z + params["conv_b"][None, :, None]
    inv_std = jax.lax.rsqrt(params["bn_var"] + bn_eps)
    scale = (params["bn_gamma"] * inv_std)[None, :, None]
    shift = (params["bn_beta"] - params["bn_mean"] * params["bn_gamma"] * inv_std)[None, :, None]
    z = z * scale + shift
    z = _active_ben(z)
    z = z.reshape(N, -1)                                               # (N, 512)
    h = _active_ben(z @ params["fc1_w"].T + params["fc1_b"])
    y = h @ params["fc2_w"].T + params["fc2_b"]
    return y


if __name__ == "__main__":
    key = jax.random.PRNGKey(0)
    ks = jax.random.split(key, 11)

    # Small shapes consistent with the module: pooled length must be 1 -> L = 5.
    N, C_in, L, num_classes = 8, 64, 5, 10
    hidden = 512

    x = jax.random.normal(ks[0], (N, C_in, L), jnp.float32)
    params = {
        "conv_w": jax.random.normal(ks[1], (hidden, C_in, 1), jnp.float32) * 0.1,
        "conv_b": jax.random.normal(ks[2], (hidden,), jnp.float32) * 0.1,
        "bn_gamma": 1.0 + 0.1 * jax.random.normal(ks[3], (hidden,), jnp.float32),
        "bn_beta": 0.1 * jax.random.normal(ks[4], (hidden,), jnp.float32),
        "bn_mean": 0.1 * jax.random.normal(ks[5], (hidden,), jnp.float32),
        "bn_var": 0.5 + jnp.abs(jax.random.normal(ks[6], (hidden,), jnp.float32)) * 0.5,
        "fc1_w": jax.random.normal(ks[7], (hidden, hidden), jnp.float32) / jnp.sqrt(hidden),
        "fc1_b": 0.1 * jax.random.normal(ks[8], (hidden,), jnp.float32),
        "fc2_w": jax.random.normal(ks[9], (num_classes, hidden), jnp.float32) / jnp.sqrt(hidden),
        "fc2_b": 0.1 * jax.random.normal(ks[10], (num_classes,), jnp.float32),
    }

    out = jax.block_until_ready(inception_aux_1d(x, params, num_classes=num_classes))
    ref = jax.block_until_ready(_reference(x, params, num_classes=num_classes))

    assert out.shape == (N, num_classes), out.shape
    # Tolerance accounts for bf16 MXU matmuls with f32 accumulation.
    assert jnp.allclose(out, ref, rtol=2e-2, atol=2e-2), (out, ref)
    print("KERNEL_OK")
</pallas_src>

<mosaic_0001>
module attributes {stable_mosaic.version = 11 : i64} {
  func.func @_inception_aux_kernel(%arg0: i32, %arg1: memref<8x320xf32, #tpu.memory_space<vmem>>, %arg2: memref<320x512xbf16, #tpu.memory_space<vmem>>, %arg3: memref<1x512xf32, #tpu.memory_space<vmem>>, %arg4: memref<512x512xbf16, #tpu.memory_space<vmem>>, %arg5: memref<1x512xf32, #tpu.memory_space<vmem>>, %arg6: memref<512x128xbf16, #tpu.memory_space<vmem>>, %arg7: memref<1x128xf32, #tpu.memory_space<vmem>>, %arg8: memref<8x128xf32, #tpu.memory_space<vmem>>) attributes {dimension_semantics = [#tpu.dimension_semantics<parallel>], iteration_bounds = array<i64: 1>, scalar_prefetch = 0 : i64, scratch_operands = 0 : i64, tpu.core_type = #tpu.core_type<tc>, window_params = [{transform_indices = @transform_0, window_bounds = array<i64: 8, 320>}, {pipeline_mode = #tpu.pipeline_mode<synchronous>, transform_indices = @transform_1, window_bounds = array<i64: 320, 512>}, {pipeline_mode = #tpu.pipeline_mode<synchronous>, transform_indices = @transform_2, window_bounds = array<i64: 1, 512>}, {pipeline_mode = #tpu.pipeline_mode<synchronous>, transform_indices = @transform_3, window_bounds = array<i64: 512, 512>}, {pipeline_mode = #tpu.pipeline_mode<synchronous>, transform_indices = @transform_4, window_bounds = array<i64: 1, 512>}, {pipeline_mode = #tpu.pipeline_mode<synchronous>, transform_indices = @transform_5, window_bounds = array<i64: 512, 128>}, {pipeline_mode = #tpu.pipeline_mode<synchronous>, transform_indices = @transform_6, window_bounds = array<i64: 1, 128>}, {transform_indices = @transform_7, window_bounds = array<i64: 8, 128>}]} {
    %c0 = arith.constant 0 : index
    %c0_0 = arith.constant 0 : index
    %0 = vector.load %arg1[%c0, %c0_0] : memref<8x320xf32, #tpu.memory_space<vmem>>, vector<8x320xf32>
    %1 = arith.truncf %0 : vector<8x320xf32> to vector<8x320xbf16>
    %c0_1 = arith.constant 0 : index
    %c0_2 = arith.constant 0 : index
    %2 = vector.load %arg2[%c0_1, %c0_2] : memref<320x512xbf16, #tpu.memory_space<vmem>>, vector<320x512xbf16>
    %cst = arith.constant dense<0.000000e+00> : vector<8x512xf32>
    %3 = tpu.matmul %1, %2, %cst {dimension_numbers = #tpu.dot_dimension_numbers<[1], [0], [0], [1], [0, 0, 1, 1], [], []>} : vector<8x320xbf16>, vector<320x512xbf16>, vector<8x512xf32> -> vector<8x512xf32>
    %c0_3 = arith.constant 0 : index
    %c0_4 = arith.constant 0 : index
    %4 = vector.load %arg3[%c0_3, %c0_4] : memref<1x512xf32, #tpu.memory_space<vmem>>, vector<1x512xf32>
    %5 = vector.broadcast %4 : vector<1x512xf32> to vector<8x512xf32>
    %6 = arith.addf %3, %5 : vector<8x512xf32>
    %7 = arith.mulf %6, %6 : vector<8x512xf32>
    %cst_5 = arith.constant 3.000000e+00 : f32
    %8 = vector.broadcast %cst_5 : f32 to vector<8x512xf32>
    %9 = arith.addf %7, %8 : vector<8x512xf32>
    %10 = arith.mulf %6, %9 : vector<8x512xf32>
    %cst_6 = arith.constant 0.166666672 : f32
    %11 = vector.broadcast %cst_6 : f32 to vector<8x512xf32>
    %12 = arith.mulf %10, %11 : vector<8x512xf32>
    %cst_7 = arith.constant -1.000000e+00 : f32
    %13 = vector.broadcast %cst_7 : f32 to vector<8x512xf32>
    %14 = arith.cmpf ole, %6, %13 : vector<8x512xf32>
    %cst_8 = arith.constant 0.333333343 : f32
    %15 = vector.broadcast %cst_8 : f32 to vector<8x512xf32>
    %16 = arith.addf %6, %15 : vector<8x512xf32>
    %cst_9 = arith.constant 1.000000e+00 : f32
    %17 = vector.broadcast %cst_9 : f32 to vector<8x512xf32>
    %18 = arith.cmpf oge, %6, %17 : vector<8x512xf32>
    %cst_10 = arith.constant 0.333333343 : f32
    %19 = vector.broadcast %cst_10 : f32 to vector<8x512xf32>
    %20 = arith.subf %6, %19 : vector<8x512xf32>
    %21 = arith.select %18, %20, %12 : vector<8x512xi1>, vector<8x512xf32>
    %22 = arith.select %14, %16, %21 : vector<8x512xi1>, vector<8x512xf32>
    %23 = arith.truncf %22 : vector<8x512xf32> to vector<8x512xbf16>
    %c0_11 = arith.constant 0 : index
    %c0_12 = arith.constant 0 : index
    %24 = vector.load %arg4[%c0_11, %c0_12] : memref<512x512xbf16, #tpu.memory_space<vmem>>, vector<512x512xbf16>
    %cst_13 = arith.constant dense<0.000000e+00> : vector<8x512xf32>
    %25 = tpu.matmul %23, %24, %cst_13 {dimension_numbers = #tpu.dot_dimension_numbers<[1], [0], [0], [1], [0, 0, 1, 1], [], []>} : vector<8x512xbf16>, vector<512x512xbf16>, vector<8x512xf32> -> vector<8x512xf32>
    %c0_14 = arith.constant 0 : index
    %c0_15 = arith.constant 0 : index
    %26 = vector.load %arg5[%c0_14, %c0_15] : memref<1x512xf32, #tpu.memory_space<vmem>>, vector<1x512xf32>
    %27 = vector.broadcast %26 : vector<1x512xf32> to vector<8x512xf32>
    %28 = arith.addf %25, %27 : vector<8x512xf32>
    %29 = arith.mulf %28, %28 : vector<8x512xf32>
    %cst_16 = arith.constant 3.000000e+00 : f32
    %30 = vector.broadcast %cst_16 : f32 to vector<8x512xf32>
    %31 = arith.addf %29, %30 : vector<8x512xf32>
    %32 = arith.mulf %28, %31 : vector<8x512xf32>
    %cst_17 = arith.constant 0.166666672 : f32
    %33 = vector.broadcast %cst_17 : f32 to vector<8x512xf32>
    %34 = arith.mulf %32, %33 : vector<8x512xf32>
    %cst_18 = arith.constant -1.000000e+00 : f32
    %35 = vector.broadcast %cst_18 : f32 to vector<8x512xf32>
    %36 = arith.cmpf ole, %28, %35 : vector<8x512xf32>
    %cst_19 = arith.constant 0.333333343 : f32
    %37 = vector.broadcast %cst_19 : f32 to vector<8x512xf32>
    %38 = arith.addf %28, %37 : vector<8x512xf32>
    %cst_20 = arith.constant 1.000000e+00 : f32
    %39 = vector.broadcast %cst_20 : f32 to vector<8x512xf32>
    %40 = arith.cmpf oge, %28, %39 : vector<8x512xf32>
    %cst_21 = arith.constant 0.333333343 : f32
    %41 = vector.broadcast %cst_21 : f32 to vector<8x512xf32>
    %42 = arith.subf %28, %41 : vector<8x512xf32>
    %43 = arith.select %40, %42, %34 : vector<8x512xi1>, vector<8x512xf32>
    %44 = arith.select %36, %38, %43 : vector<8x512xi1>, vector<8x512xf32>
    %45 = arith.truncf %44 : vector<8x512xf32> to vector<8x512xbf16>
    %c0_22 = arith.constant 0 : index
    %c0_23 = arith.constant 0 : index
    %46 = vector.load %arg6[%c0_22, %c0_23] : memref<512x128xbf16, #tpu.memory_space<vmem>>, vector<512x128xbf16>
    %cst_24 = arith.constant dense<0.000000e+00> : vector<8x128xf32>
    %47 = tpu.matmul %45, %46, %cst_24 {dimension_numbers = #tpu.dot_dimension_numbers<[1], [0], [0], [1], [0, 0, 1, 1], [], []>} : vector<8x512xbf16>, vector<512x128xbf16>, vector<8x128xf32> -> vector<8x128xf32>
    %c0_25 = arith.constant 0 : index
    %c0_26 = arith.constant 0 : index
    %48 = vector.load %arg7[%c0_25, %c0_26] : memref<1x128xf32, #tpu.memory_space<vmem>>, vector<1x128xf32>
    %49 = vector.broadcast %48 : vector<1x128xf32> to vector<8x128xf32>
    %50 = arith.addf %47, %49 : vector<8x128xf32>
    %c0_27 = arith.constant 0 : index
    %c0_28 = arith.constant 0 : index
    %51 = vector.load %arg8[%c0_27, %c0_28] : memref<8x128xf32, #tpu.memory_space<vmem>>, vector<8x128xf32>
    tpu.vector_store %arg8[%c0_27, %c0_28], %50 {strides = array<i32>} : memref<8x128xf32, #tpu.memory_space<vmem>>, vector<8x128xf32>,
    return
  }
  func.func @transform_0(%arg0: i32) -> (i32, i32) {
    %c0_i32 = arith.constant 0 : i32
    %c0_i32_0 = arith.constant 0 : i32
    return %arg0, %c0_i32 : i32, i32
  }
  func.func @transform_1(%arg0: i32) -> (i32, i32) {
    %c0_i32 = arith.constant 0 : i32
    %c0_i32_0 = arith.constant 0 : i32
    %c0_i32_1 = arith.constant 0 : i32
    return %c0_i32, %c0_i32_0 : i32, i32
  }
  func.func @transform_2(%arg0: i32) -> (i32, i32) {
    %c0_i32 = arith.constant 0 : i32
    %c0_i32_0 = arith.constant 0 : i32
    %c0_i32_1 = arith.constant 0 : i32
    return %c0_i32, %c0_i32_0 : i32, i32
  }
  func.func @transform_3(%arg0: i32) -> (i32, i32) {
    %c0_i32 = arith.constant 0 : i32
    %c0_i32_0 = arith.constant 0 : i32
    %c0_i32_1 = arith.constant 0 : i32
    return %c0_i32, %c0_i32_0 : i32, i32
  }
  func.func @transform_4(%arg0: i32) -> (i32, i32) {
    %c0_i32 = arith.constant 0 : i32
    %c0_i32_0 = arith.constant 0 : i32
    %c0_i32_1 = arith.constant 0 : i32
    return %c0_i32, %c0_i32_0 : i32, i32
  }
  func.func @transform_5(%arg0: i32) -> (i32, i32) {
    %c0_i32 = arith.constant 0 : i32
    %c0_i32_0 = arith.constant 0 : i32
    %c0_i32_1 = arith.constant 0 : i32
    return %c0_i32, %c0_i32_0 : i32, i32
  }
  func.func @transform_6(%arg0: i32) -> (i32, i32) {
    %c0_i32 = arith.constant 0 : i32
    %c0_i32_0 = arith.constant 0 : i32
    %c0_i32_1 = arith.constant 0 : i32
    return %c0_i32, %c0_i32_0 : i32, i32
  }
  func.func @transform_7(%arg0: i32) -> (i32, i32) {
    %c0_i32 = arith.constant 0 : i32
    %c0_i32_0 = arith.constant 0 : i32
    return %arg0, %c0_i32 : i32, i32
  }
}

</mosaic_0001>

<bundles_post_ra>
// kernel: tpu_custom_call.1
= control target key start
LH: loop header
LB: loop body
LE: loop exit
PB: predicated region body
PF: predicated region fallthrough
CT: control target
= control target key end

     0   :  { %12 = vsyncpa [#allocation3], 0  ;;  %s3113_s0 = inlined_call_operand.hbm [shape: f32[8,320], index: 0, kind: input, shape index: {}]   ;;  %s3114_s1 = inlined_call_operand.hbm [shape: bf16[320,512], index: 1, kind: input, shape index: {}]   ;;  %s3115_s2 = inlined_call_operand.vmem [shape: f32[1,512], index: 2, kind: input, shape index: {}]   ;;  %s3116_s3 = inlined_call_operand.hbm [shape: bf16[512,512], index: 3, kind: input, shape index: {}]   ;;  %s3117_s4 = inlined_call_operand.vmem [shape: f32[1,512], index: 4, kind: input, shape index: {}]   ;;  %s3118_s5 = inlined_call_operand.hbm [shape: bf16[512,128], index: 5, kind: input, shape index: {}]   ;;  %s3119_s6 = inlined_call_operand.vmem [shape: f32[1,128], index: 6, kind: input, shape index: {}]   ;;  %s3120_s7 = inlined_call_operand.hbm [shape: f32[8,128], index: 7, kind: output, shape index: {}]  }
   0x1   :  { %13 = vsyncpa [#allocation6], 0 }
   0x2   :  { %14 = vsyncpa [#allocation9], 0 }
   0x3   :  { %15 = vsyncpa [#allocation4], 0  ;;  %s2951_s24 = smov [#allocation5]   ;;  %s2833_s28 = scalar_lea.hbm %s3114_s1, 10240 }
   0x4   :  { %s31_s25 = sshll.u32 %s2951_s24, 4  ;;  %p2834_p0 = scmp.ne.s32.totalorder %s3114_s1, %s2833_s28  ;;  %s32_s25 = int_to_ptr.vmem [resolvable:$true] %s31_s25 }
   0x5   :  { %p2837_p1 = scmp.lt.u32.totalorder %s2833_s28, %s3114_s1 }
   0x7   :  { %p2839_p2 = pnand %p2837_p1, %p2834_p0 }
   0x9   :  { %2842 = shalt.err (!%p2839_p2)
}
   0xa   :  { %s2843_s10 = scalar_lea.vmem %s32_s25, 10240  ;;  %p2848_p4 = scmp.lt.s32.totalorder %s32_s25, %s32_s25 }
   0xb   :  { %p2844_p3 = scmp.ne.s32.totalorder %s32_s25, %s2843_s10  ;;  %p2849_p5 = scmp.lt.s32.totalorder %s2843_s10, %s2843_s10 }
   0xd   :  { %p2850_p6 = por %p2849_p5, %p2848_p4 }
   0xf   :  { %p2851_p7 = pnand %p2850_p6, %p2844_p3 }
  0x11   :  { %2854 = shalt.err (!%p2851_p7)
}
  0x12   :  { %s2952_s11 = smov 256   ;;  %s2953_s12 = smov 16  }
  0x13   :  { %37 = dma.hbm_to_vmem [thread:$0]  %s3114_s1, 10240, %s32_s25, [#allocation6], %s2952_s11, %s2952_s11, %s2953_s12  }
  0x14   :  { %s2954_s15 = smov [#allocation2]   ;;  %s2955_s17 = smov [#allocation7]  }
  0x15   :  { %s22_s16 = sshll.u32 %s2954_s15, 4  ;;  %s45_s18 = sshll.u32 %s2955_s17, 4  ;;  %s23_s16 = int_to_ptr.vmem [resolvable:$true] %s22_s16  ;;  %s46_s18 = int_to_ptr.vmem [resolvable:$true] %s45_s18 }
  0x16   :  { %s2855_s21 = scalar_lea.hbm %s3113_s0, 384 }
  0x17   :  { %p2856_p8 = scmp.ne.s32.totalorder %s3113_s0, %s2855_s21  ;;  %p2859_p9 = scmp.lt.u32.totalorder %s2855_s21, %s3113_s0 }
  0x19   :  { %p2861_p10 = pnand %p2859_p9, %p2856_p8 }
  0x1b   :  { %2864 = shalt.err (!%p2861_p10)
}
  0x1c   :  { %s2865_s1 = scalar_lea.vmem %s23_s16, 384  ;;  %p2870_p12 = scmp.lt.s32.totalorder %s23_s16, %s23_s16 }
  0x1d   :  { %p2866_p11 = scmp.ne.s32.totalorder %s23_s16, %s2865_s1  ;;  %p2871_p13 = scmp.lt.s32.totalorder %s2865_s1, %s2865_s1 }
  0x1f   :  { %p2872_p0 = por %p2871_p13, %p2870_p12 }
  0x21   :  { %p2873_p1 = pnand %p2872_p0, %p2866_p11 }
  0x23   :  { %2876 = shalt.err (!%p2873_p1)
}
  0x24   :  { %25 = dma.hbm_to_vmem [thread:$0]  %s3113_s0, 384, %s23_s16, [#allocation3]  }
  0x25   :  { %s2877_s30 = scalar_lea.hbm %s3116_s3, 16384 }
  0x26   :  { %p2878_p2 = scmp.ne.s32.totalorder %s3116_s3, %s2877_s30  ;;  %p2881_p3 = scmp.lt.u32.totalorder %s2877_s30, %s3116_s3 }
  0x28   :  { %p2883_p4 = pnand %p2881_p3, %p2878_p2 }
  0x2a   :  { %2886 = shalt.err (!%p2883_p4)
}
  0x2b   :  { %s2887_s14 = scalar_lea.vmem %s46_s18, 16384  ;;  %p2892_p6 = scmp.lt.s32.totalorder %s46_s18, %s46_s18 }
  0x2c   :  { %p2888_p5 = scmp.ne.s32.totalorder %s46_s18, %s2887_s14  ;;  %p2893_p7 = scmp.lt.s32.totalorder %s2887_s14, %s2887_s14 }
  0x2e   :  { %p2894_p8 = por %p2893_p7, %p2892_p6 }
  0x30   :  { %p2895_p9 = pnand %p2894_p8, %p2888_p5 }
  0x32   :  { %2898 = shalt.err (!%p2895_p9)
}
  0x33   :  { %51 = dma.hbm_to_vmem [thread:$0]  %s3116_s3, 16384, %s46_s18, [#allocation6], %s2952_s11, %s2952_s11, %s2953_s12  }
  0x34   :  { %s2956_s16 = smov [#allocation8]   ;;  %s2899_s21 = scalar_lea.hbm %s3118_s5, 4096 }
  0x35   :  { %s59_s17 = sshll.u32 %s2956_s16, 4  ;;  %p2900_p10 = scmp.ne.s32.totalorder %s3118_s5, %s2899_s21  ;;  %s60_s17 = int_to_ptr.vmem [resolvable:$true] %s59_s17 }
  0x36   :  { %p2903_p11 = scmp.lt.u32.totalorder %s2899_s21, %s3118_s5 }
  0x38   :  { %p2905_p12 = pnand %p2903_p11, %p2900_p10 }
  0x3a   :  { %2908 = shalt.err (!%p2905_p12)
}
  0x3b   :  { %s2909_s1 = scalar_lea.vmem %s60_s17, 4096  ;;  %p2914_p0 = scmp.lt.s32.totalorder %s60_s17, %s60_s17 }
  0x3c   :  { %p2910_p13 = scmp.ne.s32.totalorder %s60_s17, %s2909_s1  ;;  %p2915_p1 = scmp.lt.s32.totalorder %s2909_s1, %s2909_s1 }
  0x3e   :  { %p2916_p2 = por %p2915_p1, %p2914_p0 }
  0x40   :  { %p2917_p3 = pnand %p2916_p2, %p2910_p13 }
  0x42   :  { %2920 = shalt.err (!%p2917_p3)
}
  0x43   :  { %s2957_s3 = smov 64   ;;  %s2958_s11 = smov 4  }
  0x44   :  { %65 = dma.hbm_to_vmem [thread:$0]  %s3118_s5, 4096, %s60_s17, [#allocation9], %s2957_s3, %s2957_s3, %s2958_s11  }
  0x45   :  { %2943 = dma.done.wait [#allocation3], 384  }
  0x46   :  { %2944 = vsyncadd [#allocation3], 4294966912 }
  0x47   :  { %2945 = dma.done.wait [#allocation6], 26624  }
  0x48   :  { %2946 = vsyncadd [#allocation6], 4294940672 }
  0x49   :  { %2947 = dma.done.wait [#allocation9], 4096  }
  0x4a   :  { %2948 = vsyncadd [#allocation9], 4294963200  ;;  %v2489_v0 = vld [vmem:[#allocation5 + $0x4] ss:$16 sps:$4 sm:$0xff]   ;;  %v2491_v1 = vld [vmem:[#allocation5] ss:$16 sps:$4 sm:$0xff]  }
  0x4b   :  { %593 = vmatprep.subr.bf16.mxu0 %v2489_v0  ;;  %v2492_v2 = vld [vmem:[#allocation5 + $0x24] ss:$16 sps:$4 sm:$0xff]   ;;  %v2494_v3 = vld [vmem:[#allocation5 + $0x20] ss:$16 sps:$4 sm:$0xff]   ;;  %v2519_v9 = vld [vmem:[#allocation5 + $0xc] ss:$16 sps:$4 sm:$0xff]  }
  0x4c   :  { %594 = vmatpush1.bf16.msra.mxu0 %v2491_v1  ;;  %v2495_v4 = vld [vmem:[#allocation5 + $0x44] ss:$16 sps:$4 sm:$0xff]   ;;  %v2497_v5 = vld [vmem:[#allocation5 + $0x40] ss:$16 sps:$4 sm:$0xff]   ;;  %v2523_v12 = vld [vmem:[#allocation5 + $0x8] ss:$16 sps:$4 sm:$0xff]   ;;  %675 = vmatprep.subr.bf16.mxu1 %v2519_v9 }
  0x4d   :  { %595 = vmatprep.subr.bf16.mxu0 %v2492_v2  ;;  %v2498_v6 = vld [vmem:[#allocation5 + $0x64] ss:$16 sps:$4 sm:$0xff]   ;;  %v2500_v7 = vld [vmem:[#allocation5 + $0x60] ss:$16 sps:$4 sm:$0xff]   ;;  %v2525_v13 = vld [vmem:[#allocation5 + $0x2c] ss:$16 sps:$4 sm:$0xff]   ;;  %676 = vmatpush1.bf16.msra.mxu1 %v2523_v12 }
  0x4e   :  { %v2501_v8 = vld [vmem:[#allocation5 + $0x84] ss:$16 sps:$4 sm:$0xff]   ;;  %v2503_v10 = vld [vmem:[#allocation5 + $0x80] ss:$16 sps:$4 sm:$0xff]   ;;  %677 = vmatprep.subr.bf16.mxu1 %v2525_v13  ;;  %v2529_v15 = vld [vmem:[#allocation5 + $0x28] ss:$16 sps:$4 sm:$0xff]  }
  0x4f   :  { %v2504_v11 = vld [vmem:[#allocation5 + $0xa4] ss:$16 sps:$4 sm:$0xff]   ;;  %v2506_v14 = vld [vmem:[#allocation5 + $0xa0] ss:$16 sps:$4 sm:$0xff]   ;;  %v2531_v16 = vld [vmem:[#allocation5 + $0x4c] ss:$16 sps:$4 sm:$0xff]  }
  0x50   :  { %596 = vmatpush1.bf16.msra.mxu0 %v2494_v3  ;;  %v2507_v17 = vld [vmem:[#allocation5 + $0xc4] ss:$16 sps:$4 sm:$0xff]   ;;  %v2535_v18 = vld [vmem:[#allocation5 + $0x48] ss:$16 sps:$4 sm:$0xff]   ;;  %v2537_v19 = vld [vmem:[#allocation5 + $0x6c] ss:$16 sps:$4 sm:$0xff]  }
  0x51   :  { %597 = vmatprep.subr.bf16.mxu0 %v2495_v4  ;;  %678 = vmatpush1.bf16.msra.mxu1 %v2529_v15  ;;  %v2509_v20 = vld [vmem:[#allocation5 + $0xc0] ss:$16 sps:$4 sm:$0xff]   ;;  %v2510_v21 = vld [vmem:[#allocation5 + $0xe4] ss:$16 sps:$4 sm:$0xff]   ;;  %v2541_v22 = vld [vmem:[#allocation5 + $0x68] ss:$16 sps:$4 sm:$0xff]  }
  0x52   :  { %679 = vmatprep.subr.bf16.mxu1 %v2531_v16  ;;  %v2543_v23 = vld [vmem:[#allocation5 + $0x8c] ss:$16 sps:$4 sm:$0xff]   ;;  %v2512_v24 = vld [vmem:[#allocation5 + $0xe0] ss:$16 sps:$4 sm:$0xff]   ;;  %v2513_v25 = vld [vmem:[#allocation5 + $0x104] ss:$16 sps:$4 sm:$0xff]  }
  0x53   :  { %v2547_v26 = vld [vmem:[#allocation5 + $0x88] ss:$16 sps:$4 sm:$0xff]   ;;  %v2549_v27 = vld [vmem:[#allocation5 + $0xac] ss:$16 sps:$4 sm:$0xff]   ;;  %v82_v28 = vld [vmem:[#allocation2 + $0x8] sm:$0xff]  ;;  %vm589_vm0 = vcmask 523264  }
  0x54   :  { %598 = vmatpush1.bf16.msra.mxu0 %v2497_v5  ;;  %v2515_v29 = vld [vmem:[#allocation5 + $0x100] ss:$16 sps:$4 sm:$0xff]   ;;  %v85_v30 = vpack.c.bf16 %v82_v28, %v82_v28  ;;  %v2516_v31 = vld [vmem:[#allocation5 + $0x124] ss:$16 sps:$4 sm:$0xff]   ;;  %v2553_v32 = vld [vmem:[#allocation5 + $0xa8] ss:$16 sps:$4 sm:$0xff]  }
  0x55   :  { %599 = vmatprep.subr.bf16.mxu0 %v2498_v6  ;;  %680 = vmatpush1.bf16.msra.mxu1 %v2535_v18  ;;  %v2555_v33 = vld [vmem:[#allocation5 + $0xcc] ss:$16 sps:$4 sm:$0xff]   ;;  %v2518_v34 = vld [vmem:[#allocation5 + $0x120] ss:$16 sps:$4 sm:$0xff]   ;;  %v2521_v35 = vld [vmem:[#allocation5 + $0x144] ss:$16 sps:$4 sm:$0xff]  }
  0x56   :  { %681 = vmatprep.subr.bf16.mxu1 %v2537_v19  ;;  %625 = vmatprep.mubr.bf16.mxu0 %v85_v30  ;;  %v2560_v36 = vld [vmem:[#allocation5 + $0xc8] ss:$16 sps:$4 sm:$0xff]   ;;  %v2561_v37 = vld [vmem:[#allocation5 + $0xec] ss:$16 sps:$4 sm:$0xff]   ;;  %v2524_v38 = vld [vmem:[#allocation5 + $0x140] ss:$16 sps:$4 sm:$0xff]  }
  0x57   :  { %707 = vmatprep.mubr.bf16.mxu1 %v85_v30  ;;  %v2527_v39 = vld [vmem:[#allocation5 + $0x164] ss:$16 sps:$4 sm:$0xff]   ;;  %v2566_v40 = vld [vmem:[#allocation5 + $0xe8] ss:$16 sps:$4 sm:$0xff]   ;;  %v2567_v41 = vld [vmem:[#allocation5 + $0x10c] ss:$16 sps:$4 sm:$0xff]  }
  0x58   :  { %600 = vmatpush1.bf16.msra.mxu0 %v2500_v7  ;;  %v2530_v42 = vld [vmem:[#allocation5 + $0x160] ss:$16 sps:$4 sm:$0xff]   ;;  %v2533_v43 = vld [vmem:[#allocation5 + $0x184] ss:$16 sps:$4 sm:$0xff]   ;;  %v2572_v44 = vld [vmem:[#allocation5 + $0x108] ss:$16 sps:$4 sm:$0xff]  }
  0x59   :  { %601 = vmatprep.subr.bf16.mxu0 %v2501_v8  ;;  %682 = vmatpush1.bf16.msra.mxu1 %v2541_v22  ;;  %v2573_v45 = vld [vmem:[#allocation5 + $0x12c] ss:$16 sps:$4 sm:$0xff]   ;;  %v2536_v46 = vld [vmem:[#allocation5 + $0x180] ss:$16 sps:$4 sm:$0xff]   ;;  %v2539_v47 = vld [vmem:[#allocation5 + $0x1a4] ss:$16 sps:$4 sm:$0xff]  }
  0x5a   :  { %683 = vmatprep.subr.bf16.mxu1 %v2543_v23  ;;  %v2578_v48 = vld [vmem:[#allocation5 + $0x128] ss:$16 sps:$4 sm:$0xff]   ;;  %v2579_v49 = vld [vmem:[#allocation5 + $0x14c] ss:$16 sps:$4 sm:$0xff]   ;;  %v2542_v50 = vld [vmem:[#allocation5 + $0x1a0] ss:$16 sps:$4 sm:$0xff]  }
  0x5b   :  { %v2545_v51 = vld [vmem:[#allocation5 + $0x1c4] ss:$16 sps:$4 sm:$0xff]   ;;  %v2581_v52 = vld [vmem:[#allocation5 + $0x148] ss:$16 sps:$4 sm:$0xff]   ;;  %v2582_v53 = vld [vmem:[#allocation5 + $0x16c] ss:$16 sps:$4 sm:$0xff]  }
  0x5c   :  { %602 = vmatpush1.bf16.msra.mxu0 %v2503_v10  ;;  %v2548_v54 = vld [vmem:[#allocation5 + $0x1c0] ss:$16 sps:$4 sm:$0xff]   ;;  %v2551_v55 = vld [vmem:[#allocation5 + $0x1e4] ss:$16 sps:$4 sm:$0xff]   ;;  %v2584_v56 = vld [vmem:[#allocation5 + $0x168] ss:$16 sps:$4 sm:$0xff]  }
  0x5d   :  { %603 = vmatprep.subr.bf16.mxu0 %v2504_v11  ;;  %684 = vmatpush1.bf16.msra.mxu1 %v2547_v26  ;;  %v2585_v57 = vld [vmem:[#allocation5 + $0x18c] ss:$16 sps:$4 sm:$0xff]   ;;  %v2554_v58 = vld [vmem:[#allocation5 + $0x1e0] ss:$16 sps:$4 sm:$0xff]   ;;  %v2559_v60 = vld [vmem:[#allocation5 + $0x204] ss:$16 sps:$4 sm:$0xff]  }
  0x5e   :  { %685 = vmatprep.subr.bf16.mxu1 %v2549_v27  ;;  %v81_v59 = vld [vmem:[#allocation2] sm:$0xff]  ;;  %v2557_v0 = vld [vmem:[#allocation5 + $0x200] ss:$16 sps:$4 sm:$0xff]   ;;  %v2565_v1 = vld [vmem:[#allocation5 + $0x224] ss:$16 sps:$4 sm:$0xff]   ;;  %v2959_v5 = vmov 0  }
  0x5f   :  { %v2587_v61 = vld [vmem:[#allocation5 + $0x188] ss:$16 sps:$4 sm:$0xff]   ;;  %v84_v62 = vpack.c.bf16 %v81_v59, %v81_v59  ;;  %v2588_v63 = vld [vmem:[#allocation5 + $0x1ac] ss:$16 sps:$4 sm:$0xff]   ;;  %v2563_v4 = vld [vmem:[#allocation5 + $0x220] ss:$16 sps:$4 sm:$0xff]  }
  0x60   :  { %604 = vmatpush1.bf16.msra.mxu0 %v2506_v14  ;;  %v2590_v2 = vld [vmem:[#allocation5 + $0x1a8] ss:$16 sps:$4 sm:$0xff]   ;;  %v2591_v3 = vld [vmem:[#allocation5 + $0x1cc] ss:$16 sps:$4 sm:$0xff]   ;;  %v2571_v6 = vld [vmem:[#allocation5 + $0x244] ss:$16 sps:$4 sm:$0xff]  }
  0x61   :  { %605 = vmatprep.subr.bf16.mxu0 %v2507_v17  ;;  %686 = vmatpush1.bf16.msra.mxu1 %v2553_v32  ;;  %v2593_v7 = vld [vmem:[#allocation5 + $0x1c8] ss:$16 sps:$4 sm:$0xff]   ;;  %v2594_v8 = vld [vmem:[#allocation5 + $0x1ec] ss:$16 sps:$4 sm:$0xff]   ;;  %v2569_v9 = vld [vmem:[#allocation5 + $0x240] ss:$16 sps:$4 sm:$0xff]  }
  0x62   :  { %687 = vmatprep.subr.bf16.mxu1 %v2555_v33  ;;  %v2577_v10 = vld [vmem:[#allocation5 + $0x264] ss:$16 sps:$4 sm:$0xff]   ;;  %v2596_v11 = vld [vmem:[#allocation5 + $0x1e8] ss:$16 sps:$4 sm:$0xff]   ;;  %v2599_v12 = vld [vmem:[#allocation5 + $0x20c] ss:$16 sps:$4 sm:$0xff]  }
  0x63   :  { %v2575_v13 = vld [vmem:[#allocation5 + $0x260] ss:$16 sps:$4 sm:$0xff]   ;;  %v83_v14 = vld [vmem:[#allocation2 + $0x10] sm:$0xff]  ;;  %v2611_v15 = vld [vmem:[#allocation7 + $0x4] ss:$16 sps:$4 sm:$0xff]   ;;  %s2960_s29 = smov [#allocation10]  }
  0x64   :  { %606 = vmatpush1.bf16.msra.mxu0 %v2509_v20  ;;  %v2597_v16 = vld [vmem:[#allocation5 + $0x208] ss:$16 sps:$4 sm:$0xff]   ;;  %v86_v17 = vpack.c.bf16 %v83_v14, %v83_v14  ;;  %v2602_v18 = vld [vmem:[#allocation5 + $0x22c] ss:$16 sps:$4 sm:$0xff]   ;;  %v2609_v19 = vld [vmem:[#allocation7] ss:$16 sps:$4 sm:$0xff]  }
  0x65   :  { %607 = vmatprep.subr.bf16.mxu0 %v2510_v21  ;;  %688 = vmatpush1.bf16.msra.mxu1 %v2560_v36  ;;  %v2617_v20 = vld [vmem:[#allocation7 + $0x24] ss:$16 sps:$4 sm:$0xff]   ;;  %v2600_v21 = vld [vmem:[#allocation5 + $0x228] ss:$16 sps:$4 sm:$0xff]   ;;  %v2605_v22 = vld [vmem:[#allocation5 + $0x24c] ss:$16 sps:$4 sm:$0xff]  }
  0x66   :  { %689 = vmatprep.subr.bf16.mxu1 %v2561_v37  ;;  %v2615_v23 = vld [vmem:[#allocation7 + $0x20] ss:$16 sps:$4 sm:$0xff]   ;;  %v2608_v26 = vld [vmem:[#allocation5 + $0x26c] ss:$16 sps:$4 sm:$0xff]   ;;  %v2629_v28 = vld [vmem:[#allocation7 + $0x64] ss:$16 sps:$4 sm:$0xff]  }
  0x67   :  { %v2621_v27 = vld [vmem:[#allocation7 + $0x40] ss:$16 sps:$4 sm:$0xff]   ;;  %v2614_v30 = vld [vmem:[#allocation7 + $0xc] ss:$16 sps:$4 sm:$0xff]   ;;  %v2635_v32 = vld [vmem:[#allocation7 + $0x84] ss:$16 sps:$4 sm:$0xff]  }
  0x68   :  { %608 = vmatpush1.bf16.msra.mxu0 %v2512_v24  ;;  %v2603_v24 = vld [vmem:[#allocation5 + $0x248] ss:$16 sps:$4 sm:$0xff]   ;;  %v2641_v36 = vld [vmem:[#allocation7 + $0xa4] ss:$16 sps:$4 sm:$0xff]   ;;  %v2669_v59 = vld [vmem:[#allocation7 + $0x140] ss:$16 sps:$4 sm:$0xff]  }
  0x69   :  { %609 = vmatprep.subr.bf16.mxu0 %v2513_v25  ;;  %690 = vmatpush1.bf16.msra.mxu1 %v2566_v40  ;;  %v2623_v25 = vld [vmem:[#allocation7 + $0x44] ss:$16 sps:$4 sm:$0xff]   ;;  %v2612_v33 = vld [vmem:[#allocation7 + $0x8] ss:$16 sps:$4 sm:$0xff]   ;;  %s2149_s30 = sshll.u32 %s2960_s29, 4  ;;  %s2150_s30 = int_to_ptr.vmem [resolvable:$true] %s2149_s30 }
  0x6a   :  { %691 = vmatprep.subr.bf16.mxu1 %v2567_v41  ;;  %v2618_v37 = vld [vmem:[#allocation7 + $0x28] ss:$16 sps:$4 sm:$0xff]   ;;  %v2647_v40 = vld [vmem:[#allocation7 + $0xc4] ss:$16 sps:$4 sm:$0xff]   ;;  %s2921_s8 = scalar_lea.vmem %s2150_s30, 128  ;;  %p2926_p5 = scmp.lt.s32.totalorder %s2150_s30, %s2150_s30 }
  0x6b   :  { %v2624_v41 = vld [vmem:[#allocation7 + $0x48] ss:$16 sps:$4 sm:$0xff]   ;;  %p2922_p4 = scmp.ne.s32.totalorder %s2150_s30, %s2921_s8  ;;  %p2927_p6 = scmp.lt.s32.totalorder %s2921_s8, %s2921_s8 }
  0x6c   :  { %610 = vmatpush1.bf16.msra.mxu0 %v2515_v29  ;;  %v2606_v29 = vld [vmem:[#allocation5 + $0x268] ss:$16 sps:$4 sm:$0xff]  }
  0x6d   :  { %611 = vmatprep.subr.bf16.mxu0 %v2516_v31  ;;  %692 = vmatpush1.bf16.msra.mxu1 %v2572_v44  ;;  %v2627_v31 = vld [vmem:[#allocation7 + $0x60] ss:$16 sps:$4 sm:$0xff]   ;;  %v2653_v44 = vld [vmem:[#allocation7 + $0xe4] ss:$16 sps:$4 sm:$0xff]   ;;  %v2690_v14 = vld [vmem:[#allocation7 + $0x1a8] ss:$16 sps:$4 sm:$0xff]   ;;  %p2928_p7 = por %p2927_p6, %p2926_p5 }
  0x6e   :  { %693 = vmatprep.subr.bf16.mxu1 %v2573_v45  ;;  %v2630_v45 = vld [vmem:[#allocation7 + $0x68] ss:$16 sps:$4 sm:$0xff]  }
  0x6f   :  { %p2929_p8 = pnand %p2928_p7, %p2922_p4 }
  0x70   :  { %612 = vmatpush1.bf16.msra.mxu0 %v2518_v34  ;;  %v2620_v34 = vld [vmem:[#allocation7 + $0x2c] ss:$16 sps:$4 sm:$0xff]  }
  0x71   :  { %613 = vmatprep.subr.bf16.mxu0 %v2521_v35  ;;  %694 = vmatpush1.bf16.msra.mxu1 %v2578_v48  ;;  %v2633_v35 = vld [vmem:[#allocation7 + $0x80] ss:$16 sps:$4 sm:$0xff]   ;;  %v2659_v48 = vld [vmem:[#allocation7 + $0x104] ss:$16 sps:$4 sm:$0xff]  }
  0x72   :  { %695 = vmatprep.subr.bf16.mxu1 %v2579_v49  ;;  %v2636_v49 = vld [vmem:[#allocation7 + $0x88] ss:$16 sps:$4 sm:$0xff]  }
  0x74   :  { %614 = vmatpush1.bf16.msra.mxu0 %v2524_v38  ;;  %v2626_v38 = vld [vmem:[#allocation7 + $0x4c] ss:$16 sps:$4 sm:$0xff]  }
  0x75   :  { %615 = vmatprep.subr.bf16.mxu0 %v2527_v39  ;;  %696 = vmatpush1.bf16.msra.mxu1 %v2581_v52  ;;  %v2639_v39 = vld [vmem:[#allocation7 + $0xa0] ss:$16 sps:$4 sm:$0xff]   ;;  %v2665_v52 = vld [vmem:[#allocation7 + $0x124] ss:$16 sps:$4 sm:$0xff]  }
  0x76   :  { %697 = vmatprep.subr.bf16.mxu1 %v2582_v53  ;;  %v2642_v53 = vld [vmem:[#allocation7 + $0xa8] ss:$16 sps:$4 sm:$0xff]  }
  0x78   :  { %616 = vmatpush1.bf16.msra.mxu0 %v2530_v42  ;;  %v2632_v42 = vld [vmem:[#allocation7 + $0x6c] ss:$16 sps:$4 sm:$0xff]  }
  0x79   :  { %617 = vmatprep.subr.bf16.mxu0 %v2533_v43  ;;  %698 = vmatpush1.bf16.msra.mxu1 %v2584_v56  ;;  %v2645_v43 = vld [vmem:[#allocation7 + $0xc0] ss:$16 sps:$4 sm:$0xff]   ;;  %v2671_v56 = vld [vmem:[#allocation7 + $0x144] ss:$16 sps:$4 sm:$0xff]  }
  0x7a   :  { %699 = vmatprep.subr.bf16.mxu1 %v2585_v57  ;;  %v2648_v57 = vld [vmem:[#allocation7 + $0xc8] ss:$16 sps:$4 sm:$0xff]  }
  0x7c   :  { %618 = vmatpush1.bf16.msra.mxu0 %v2536_v46  ;;  %v2638_v46 = vld [vmem:[#allocation7 + $0x8c] ss:$16 sps:$4 sm:$0xff]  }
  0x7d   :  { %619 = vmatprep.subr.bf16.mxu0 %v2539_v47  ;;  %700 = vmatpush1.bf16.msra.mxu1 %v2587_v61  ;;  %v2651_v47 = vld [vmem:[#allocation7 + $0xe0] ss:$16 sps:$4 sm:$0xff]   ;;  %v2654_v61 = vld [vmem:[#allocation7 + $0xe8] ss:$16 sps:$4 sm:$0xff]  }
  0x7e   :  { %701 = vmatprep.subr.bf16.mxu1 %v2588_v63  ;;  %v2675_v63 = vld [vmem:[#allocation7 + $0x160] ss:$16 sps:$4 sm:$0xff]  }
  0x80   :  { %620 = vmatpush1.bf16.msra.mxu0 %v2542_v50  ;;  %v2644_v50 = vld [vmem:[#allocation7 + $0xac] ss:$16 sps:$4 sm:$0xff]  }
  0x81   :  { %621 = vmatprep.subr.bf16.mxu0 %v2545_v51  ;;  %702 = vmatpush1.bf16.msra.mxu1 %v2590_v2  ;;  %v2657_v51 = vld [vmem:[#allocation7 + $0x100] ss:$16 sps:$4 sm:$0xff]   ;;  %v2666_v2 = vld [vmem:[#allocation7 + $0x128] ss:$16 sps:$4 sm:$0xff]  }
  0x82   :  { %703 = vmatprep.subr.bf16.mxu1 %v2591_v3  ;;  %v2674_v3 = vld [vmem:[#allocation7 + $0x14c] ss:$16 sps:$4 sm:$0xff]  }
  0x84   :  { %622 = vmatpush1.bf16.msra.mxu0 %v2548_v54  ;;  %v2650_v54 = vld [vmem:[#allocation7 + $0xcc] ss:$16 sps:$4 sm:$0xff]  }
  0x85   :  { %623 = vmatprep.subr.bf16.mxu0 %v2551_v55  ;;  %704 = vmatpush1.bf16.msra.mxu1 %v2593_v7  ;;  %v2663_v55 = vld [vmem:[#allocation7 + $0x120] ss:$16 sps:$4 sm:$0xff]   ;;  %v2683_v7 = vld [vmem:[#allocation7 + $0x184] ss:$16 sps:$4 sm:$0xff]  }
  0x86   :  { %705 = vmatprep.subr.bf16.mxu1 %v2594_v8  ;;  %v2686_v8 = vld [vmem:[#allocation7 + $0x18c] ss:$16 sps:$4 sm:$0xff]  }
  0x88   :  { %624 = vmatpush1.bf16.msra.mxu0 %v2554_v58  ;;  %v2656_v58 = vld [vmem:[#allocation7 + $0xec] ss:$16 sps:$4 sm:$0xff]  }
  0x89   :  { %634 = vmatprep.subr.bf16.mxu0 %v2559_v60  ;;  %706 = vmatpush1.bf16.msra.mxu1 %v2596_v11  ;;  %v2677_v60 = vld [vmem:[#allocation7 + $0x164] ss:$16 sps:$4 sm:$0xff]  }
  0x8a   :  { %716 = vmatprep.subr.bf16.mxu1 %v2599_v12  ;;  %v2689_v11 = vld [vmem:[#allocation7 + $0x1a4] ss:$16 sps:$4 sm:$0xff]   ;;  %v2692_v12 = vld [vmem:[#allocation7 + $0x1ac] ss:$16 sps:$4 sm:$0xff]  }
  0x8b   :  { %626 = vmatmul.mubr.bf16.vlgmr.msra.gmra.mrb[0].mxu0 %v84_v62 }
  0x8c   :  { %635 = vmatpush1.bf16.msra.mxu0 %v2557_v0  ;;  %666 = vmatprep.mubr.bf16.mxu0 %v2959_v5  ;;  %v2660_v0 = vld [vmem:[#allocation7 + $0x108] ss:$16 sps:$4 sm:$0xff]  }
  0x8d   :  { %636 = vmatprep.subr.bf16.mxu0 %v2565_v1  ;;  %708 = vmatmul.mubr.bf16.vlgmr.msra.gmra.mrb[0].mxu1 %v84_v62  ;;  %v2662_v62 = vld [vmem:[#allocation7 + $0x10c] ss:$16 sps:$4 sm:$0xff]  }
  0x8e   :  { %717 = vmatpush1.bf16.msra.mxu1 %v2597_v16  ;;  %748 = vmatprep.mubr.bf16.mxu1 %v2959_v5  ;;  %v2668_v1 = vld [vmem:[#allocation7 + $0x12c] ss:$16 sps:$4 sm:$0xff]  }
  0x8f   :  { %718 = vmatprep.subr.bf16.mxu1 %v2602_v18  ;;  %v2680_v5 = vld [vmem:[#allocation7 + $0x16c] ss:$16 sps:$4 sm:$0xff]   ;;  %v2696_v18 = vld [vmem:[#allocation7 + $0x1c8] ss:$16 sps:$4 sm:$0xff]  }
  0x90   :  { %637 = vmatpush1.bf16.msra.mxu0 %v2563_v4  ;;  %v2672_v4 = vld [vmem:[#allocation7 + $0x148] ss:$16 sps:$4 sm:$0xff]   ;;  %v2698_v16 = vld [vmem:[#allocation7 + $0x1cc] ss:$16 sps:$4 sm:$0xff]  }
  0x91   :  { %638 = vmatprep.subr.bf16.mxu0 %v2571_v6  ;;  %v2678_v6 = vld [vmem:[#allocation7 + $0x168] ss:$16 sps:$4 sm:$0xff]  }
  0x92   :  { %719 = vmatpush1.bf16.msra.mxu1 %v2600_v21  ;;  %v2699_v21 = vld [vmem:[#allocation7 + $0x1e0] ss:$16 sps:$4 sm:$0xff]  }
  0x93   :  { %720 = vmatprep.subr.bf16.mxu1 %v2605_v22  ;;  %v2702_v22 = vld [vmem:[#allocation7 + $0x1e8] ss:$16 sps:$4 sm:$0xff]  }
  0x94   :  { %639 = vmatpush1.bf16.msra.mxu0 %v2569_v9  ;;  %v2681_v9 = vld [vmem:[#allocation7 + $0x180] ss:$16 sps:$4 sm:$0xff]  }
  0x95   :  { %640 = vmatprep.subr.bf16.mxu0 %v2577_v10  ;;  %v2684_v10 = vld [vmem:[#allocation7 + $0x188] ss:$16 sps:$4 sm:$0xff]  }
  0x96   :  { %721 = vmatpush1.bf16.msra.mxu1 %v2603_v24  ;;  %v2710_v24 = vld [vmem:[#allocation7 + $0x20c] ss:$16 sps:$4 sm:$0xff]  }
  0x97   :  { %722 = vmatprep.subr.bf16.mxu1 %v2608_v26 }
  0x98   :  { %641 = vmatpush1.bf16.msra.mxu0 %v2575_v13  ;;  %v2687_v13 = vld [vmem:[#allocation7 + $0x1a0] ss:$16 sps:$4 sm:$0xff]  }
  0x99   :  { %1591 = vmatprep.subr.bf16.mxu0 %v2611_v15  ;;  %v2695_v15 = vld [vmem:[#allocation7 + $0x1c4] ss:$16 sps:$4 sm:$0xff]  }
  0x9a   :  { %723 = vmatpush1.bf16.msra.mxu1 %v2606_v29 }
  0x9b   :  { %2240 = vmatmul.mubr.msk.bf16.vlgmr.msra.gmra.mrb[0].mxu0 %vm589_vm0, %v86_v17  ;;  %1673 = vmatprep.subr.bf16.mxu1 %v2614_v30 }
  0x9c   :  { %1592 = vmatpush1.bf16.msra.mxu0 %v2609_v19  ;;  %v2701_v19 = vld [vmem:[#allocation7 + $0x1e4] ss:$16 sps:$4 sm:$0xff]  }
  0x9d   :  { %1593 = vmatprep.subr.bf16.mxu0 %v2617_v20  ;;  %2241 = vmatmul.mubr.msk.bf16.vlgmr.msra.gmra.mrb[0].mxu1 %vm589_vm0, %v86_v17  ;;  %v2693_v17 = vld [vmem:[#allocation7 + $0x1c0] ss:$16 sps:$4 sm:$0xff]   ;;  %v2704_v20 = vld [vmem:[#allocation7 + $0x1ec] ss:$16 sps:$4 sm:$0xff]  }
  0x9e   :  { %1674 = vmatpush1.bf16.msra.mxu1 %v2612_v33 }
  0x9f   :  { %1675 = vmatprep.subr.bf16.mxu1 %v2620_v34 }
  0xa0   :  { %1594 = vmatpush1.bf16.msra.mxu0 %v2615_v23  ;;  %v2707_v23 = vld [vmem:[#allocation7 + $0x204] ss:$16 sps:$4 sm:$0xff]  }
  0xa1   :  { %1595 = vmatprep.subr.bf16.mxu0 %v2623_v25  ;;  %v169_v25 = vlaneseq }
  0xa2   :  { %1676 = vmatpush1.bf16.msra.mxu1 %v2618_v37 }
  0xa3   :  { %1677 = vmatprep.subr.bf16.mxu1 %v2626_v38  ;;  %v3057_v26 = vshrl.u32 %v169_v25, 7  ;;  %v2732_v25 = vld [vmem:[#allocation7 + $0x288] ss:$16 sps:$4 sm:$0xff]  }
  0xa4   :  { %1596 = vmatpush1.bf16.msra.mxu0 %v2621_v27 }
  0xa5   :  { %1597 = vmatprep.subr.bf16.mxu0 %v2629_v28  ;;  %v171_v27 = vsub.s32 0, %v3057_v26  ;;  %v3063_v28 = vld [vmem:[%s3115_s2] sm:$0xf]  ;;  %v175_v29 = vsub.s32 1, %v3057_v26 }
  0xa6   :  { %1678 = vmatpush1.bf16.msra.mxu1 %v2624_v41 }
  0xa7   :  { %1679 = vmatprep.subr.bf16.mxu1 %v2632_v42  ;;  %v172_v30 = vrot.slane %v3063_v28, %v171_v27 }
  0xa8   :  { %1598 = vmatpush1.bf16.msra.mxu0 %v2627_v31  ;;  %v176_v31 = vrot.slane %v3063_v28, %v175_v29 }
  0xa9   :  { %1599 = vmatprep.subr.bf16.mxu0 %v2635_v32 }
  0xaa   :  { %1680 = vmatpush1.bf16.msra.mxu1 %v2630_v45 }
  0xab   :  { %1681 = vmatprep.subr.bf16.mxu1 %v2638_v46 }
  0xac   :  { %1600 = vmatpush1.bf16.msra.mxu0 %v2633_v35 }
  0xad   :  { %1601 = vmatprep.subr.bf16.mxu0 %v2641_v36 }
  0xae   :  { %1682 = vmatpush1.bf16.msra.mxu1 %v2636_v49 }
  0xaf   :  { %1683 = vmatprep.subr.bf16.mxu1 %v2644_v50 }
  0xb0   :  { %1602 = vmatpush1.bf16.msra.mxu0 %v2639_v39 }
  0xb1   :  { %1603 = vmatprep.subr.bf16.mxu0 %v2647_v40 }
  0xb2   :  { %1684 = vmatpush1.bf16.msra.mxu1 %v2642_v53 }
  0xb3   :  { %1685 = vmatprep.subr.bf16.mxu1 %v2650_v54 }
  0xb4   :  { %1604 = vmatpush1.bf16.msra.mxu0 %v2645_v43 }
  0xb5   :  { %1605 = vmatprep.subr.bf16.mxu0 %v2653_v44  ;;  %v183_v44 = vsub.s32 3, %v3057_v26 }
  0xb6   :  { %1686 = vmatpush1.bf16.msra.mxu1 %v2648_v57  ;;  %v2705_v57 = vld [vmem:[#allocation7 + $0x200] ss:$16 sps:$4 sm:$0xff]  }
  0xb7   :  { %1687 = vmatprep.subr.bf16.mxu1 %v2656_v58  ;;  %v184_v54 = vrot.slane %v3063_v28, %v183_v44  ;;  %v2708_v58 = vld [vmem:[#allocation7 + $0x208] ss:$16 sps:$4 sm:$0xff]  }
  0xb8   :  { %1606 = vmatpush1.bf16.msra.mxu0 %v2651_v47 }
  0xb9   :  { %1607 = vmatprep.subr.bf16.mxu0 %v2659_v48 }
  0xba   :  { %1688 = vmatpush1.bf16.msra.mxu1 %v2654_v61  ;;  %v2713_v61 = vld [vmem:[#allocation7 + $0x224] ss:$16 sps:$4 sm:$0xff]  }
  0xbb   :  { %1689 = vmatprep.subr.bf16.mxu1 %v2662_v62  ;;  %v2716_v62 = vld [vmem:[#allocation7 + $0x22c] ss:$16 sps:$4 sm:$0xff]  }
  0xbc   :  { %1608 = vmatpush1.bf16.msra.mxu0 %v2657_v51 }
  0xbd   :  { %1609 = vmatprep.subr.bf16.mxu0 %v2665_v52 }
  0xbe   :  { %1690 = vmatpush1.bf16.msra.mxu1 %v2660_v0 }
  0xbf   :  { %1691 = vmatprep.subr.bf16.mxu1 %v2668_v1 }
  0xc0   :  { %1610 = vmatpush1.bf16.msra.mxu0 %v2663_v55 }
  0xc1   :  { %1611 = vmatprep.subr.bf16.mxu0 %v2671_v56 }
  0xc2   :  { %1692 = vmatpush1.bf16.msra.mxu1 %v2666_v2 }
  0xc3   :  { %1693 = vmatprep.subr.bf16.mxu1 %v2674_v3  ;;  %v2711_v3 = vld [vmem:[#allocation7 + $0x220] ss:$16 sps:$4 sm:$0xff]  }
  0xc4   :  { %1612 = vmatpush1.bf16.msra.mxu0 %v2669_v59 }
  0xc5   :  { %1613 = vmatprep.subr.bf16.mxu0 %v2677_v60 }
  0xc6   :  { %1694 = vmatpush1.bf16.msra.mxu1 %v2672_v4  ;;  %v2714_v4 = vld [vmem:[#allocation7 + $0x228] ss:$16 sps:$4 sm:$0xff]  }
  0xc7   :  { %1695 = vmatprep.subr.bf16.mxu1 %v2680_v5 }
  0xc8   :  { %1614 = vmatpush1.bf16.msra.mxu0 %v2675_v63 }
  0xc9   :  { %1615 = vmatprep.subr.bf16.mxu0 %v2683_v7  ;;  %v2722_v7 = vld [vmem:[#allocation7 + $0x24c] ss:$16 sps:$4 sm:$0xff]  }
  0xca   :  { %1696 = vmatpush1.bf16.msra.mxu1 %v2678_v6  ;;  %v2719_v6 = vld [vmem:[#allocation7 + $0x244] ss:$16 sps:$4 sm:$0xff]  }
  0xcb   :  { %1697 = vmatprep.subr.bf16.mxu1 %v2686_v8 }
  0xcc   :  { %1616 = vmatpush1.bf16.msra.mxu0 %v2681_v9  ;;  %v2717_v9 = vld [vmem:[#allocation7 + $0x240] ss:$16 sps:$4 sm:$0xff]  }
  0xcd   :  { %1617 = vmatprep.subr.bf16.mxu0 %v2689_v11  ;;  %v2725_v11 = vld [vmem:[#allocation7 + $0x264] ss:$16 sps:$4 sm:$0xff]  }
  0xce   :  { %1698 = vmatpush1.bf16.msra.mxu1 %v2684_v10  ;;  %v2720_v10 = vld [vmem:[#allocation7 + $0x248] ss:$16 sps:$4 sm:$0xff]  }
  0xcf   :  { %1699 = vmatprep.subr.bf16.mxu1 %v2692_v12 }
  0xd0   :  { %1618 = vmatpush1.bf16.msra.mxu0 %v2687_v13 }
  0xd1   :  { %1619 = vmatprep.subr.bf16.mxu0 %v2695_v15 }
  0xd2   :  { %1700 = vmatpush1.bf16.msra.mxu1 %v2690_v14  ;;  %v2728_v14 = vld [vmem:[#allocation7 + $0x26c] ss:$16 sps:$4 sm:$0xff]  }
  0xd3   :  { %1701 = vmatprep.subr.bf16.mxu1 %v2698_v16 }
  0xd4   :  { %1620 = vmatpush1.bf16.msra.mxu0 %v2693_v17  ;;  %v2723_v17 = vld [vmem:[#allocation7 + $0x260] ss:$16 sps:$4 sm:$0xff]  }
  0xd5   :  { %1621 = vmatprep.subr.bf16.mxu0 %v2701_v19 }
  0xd6   :  { %1702 = vmatpush1.bf16.msra.mxu1 %v2696_v18  ;;  %v2726_v18 = vld [vmem:[#allocation7 + $0x268] ss:$16 sps:$4 sm:$0xff]  }
  0xd7   :  { %1703 = vmatprep.subr.bf16.mxu1 %v2704_v20  ;;  %v2731_v20 = vld [vmem:[#allocation7 + $0x284] ss:$16 sps:$4 sm:$0xff]  }
  0xd8   :  { %1622 = vmatpush1.bf16.msra.mxu0 %v2699_v21  ;;  %v2734_v21 = vld [vmem:[#allocation7 + $0x28c] ss:$16 sps:$4 sm:$0xff]  }
  0xd9   :  { %1632 = vmatprep.subr.bf16.mxu0 %v2707_v23 }
  0xda   :  { %1704 = vmatpush1.bf16.msra.mxu1 %v2702_v22 }
  0xdb   :  { %1714 = vmatprep.subr.bf16.mxu1 %v2710_v24  ;;  %v2729_v24 = vld [vmem:[#allocation7 + $0x280] ss:$16 sps:$4 sm:$0xff]  }
 0x16e   :  { %v668_v32 = vpop.f32.mrb[0].mxu0 }
 0x16f   :  { %v2455_v33 = vadd.f32 %v668_v32, %v172_v30  ;;  %v670_v34 = vpop.f32.mrb[1].mxu0  ;;  %v2737_v30 = vld [vmem:[#allocation7 + $0x2a4] ss:$16 sps:$4 sm:$0xff]   ;;  %v2735_v32 = vld [vmem:[#allocation7 + $0x2a0] ss:$16 sps:$4 sm:$0xff]  }
 0x170   :  { %v2456_v35 = vadd.f32 %v670_v34, %v176_v31  ;;  %v672_v36 = vpop.f32.mrb[2].mxu0  ;;  %v3076_v59 = vpop.f32.mrb[0].mxu1  ;;  %v2740_v31 = vld [vmem:[#allocation7 + $0x2ac] ss:$16 sps:$4 sm:$0xff]   ;;  %v2743_v34 = vld [vmem:[#allocation7 + $0x2c4] ss:$16 sps:$4 sm:$0xff]  }
 0x171   :  { %v673_v37 = vpop.f32.mrb[3].mxu0  ;;  %v757_v38 = vmul.f32 %v2455_v33, %v2455_v33  ;;  %v777_v46 = vadd.f32 0.33333334, %v2455_v33  ;;  %v2242_v47 = vadd.f32 -0.33333334, %v2455_v33  ;;  %vm781_vm1 = vcmp.ge.f32.partialorder %v2455_v33, 1.0 }
 0x172   :  { %v758_v39 = vmul.f32 %v2456_v35, %v2456_v35  ;;  %v2243_v49 = vadd.f32 -0.33333334, %v2456_v35  ;;  %v778_v50 = vadd.f32 0.33333334, %v2456_v35  ;;  %vm782_vm2 = vcmp.ge.f32.partialorder %v2456_v35, 1.0  ;;  %v752_v63 = vpop.f32.mrb[1].mxu1 }
 0x173   :  { %v761_v40 = vadd.f32 3.0, %v757_v38  ;;  %vm773_vm3 = vcmp.le.f32.partialorder %v2455_v33, -1.0  ;;  %vm774_vm4 = vcmp.le.f32.partialorder %v2456_v35, -1.0  ;;  %v2458_v0 = vadd.f32 %v752_v63, %v184_v54  ;;  %v754_v1 = vpop.f32.mrb[2].mxu1  ;;  %v2741_v36 = vld [vmem:[#allocation7 + $0x2c0] ss:$16 sps:$4 sm:$0xff]  }
 0x174   :  { %v762_v41 = vadd.f32 3.0, %v758_v39  ;;  %v755_v2 = vpop.f32.mrb[3].mxu1  ;;  %v2744_v37 = vld [vmem:[#allocation7 + $0x2c8] ss:$16 sps:$4 sm:$0xff]   ;;  %v2749_v38 = vld [vmem:[#allocation7 + $0x2e4] ss:$16 sps:$4 sm:$0xff]  }
 0x175   :  { %v765_v42 = vmul.f32 %v2455_v33, %v761_v40  ;;  %v760_v5 = vmul.f32 %v2458_v0, %v2458_v0  ;;  %v2245_v13 = vadd.f32 -0.33333334, %v2458_v0  ;;  %v780_v15 = vadd.f32 0.33333334, %v2458_v0  ;;  %v2738_v33 = vld [vmem:[#allocation7 + $0x2a8] ss:$16 sps:$4 sm:$0xff]  }
 0x176   :  { %v766_v43 = vmul.f32 %v2456_v35, %v762_v41  ;;  %vm784_vm5 = vcmp.ge.f32.partialorder %v2458_v0, 1.0  ;;  %vm776_vm6 = vcmp.le.f32.partialorder %v2458_v0, -1.0  ;;  %v2746_v35 = vld [vmem:[#allocation7 + $0x2cc] ss:$16 sps:$4 sm:$0xff]   ;;  %v2747_v40 = vld [vmem:[#allocation7 + $0x2e0] ss:$16 sps:$4 sm:$0xff]  }
 0x177   :  { %v769_v45 = vmul.f32 0.16666667, %v765_v42  ;;  %v764_v8 = vadd.f32 3.0, %v760_v5  ;;  %v2752_v39 = vld [vmem:[#allocation7 + $0x2ec] ss:$16 sps:$4 sm:$0xff]  }
 0x178   :  { %v770_v48 = vmul.f32 0.16666667, %v766_v43  ;;  %v2750_v41 = vld [vmem:[#allocation7 + $0x2e8] ss:$16 sps:$4 sm:$0xff]   ;;  %v2755_v42 = vld [vmem:[#allocation7 + $0x304] ss:$16 sps:$4 sm:$0xff]  }
 0x179   :  { %v789_v51 = vsel %vm781_vm1, %v2242_v47, %v769_v45  ;;  %v768_v12 = vmul.f32 %v2458_v0, %v764_v8  ;;  %v2758_v43 = vld [vmem:[#allocation7 + $0x30c] ss:$16 sps:$4 sm:$0xff]   ;;  %v179_v45 = vsub.s32 2, %v3057_v26  ;;  %v2756_v47 = vld [vmem:[#allocation7 + $0x308] ss:$16 sps:$4 sm:$0xff]  }
 0x17a   :  { %v790_v52 = vsel %vm782_vm2, %v2243_v49, %v770_v48  ;;  %v793_v53 = vsel %vm773_vm3, %v777_v46, %v789_v51  ;;  %v2753_v46 = vld [vmem:[#allocation7 + $0x300] ss:$16 sps:$4 sm:$0xff]   ;;  %v2761_v48 = vld [vmem:[#allocation7 + $0x324] ss:$16 sps:$4 sm:$0xff]   ;;  %v2764_v49 = vld [vmem:[#allocation7 + $0x32c] ss:$16 sps:$4 sm:$0xff]  }
 0x17b   :  { %v794_v55 = vsel %vm774_vm4, %v778_v50, %v790_v52  ;;  %v797_v60 = vpack.c.bf16 %v793_v53, %v793_v53  ;;  %v772_v16 = vmul.f32 0.16666667, %v768_v12  ;;  %v180_v50 = vrot.slane %v3063_v28, %v179_v45  ;;  %v2759_v51 = vld [vmem:[#allocation7 + $0x320] ss:$16 sps:$4 sm:$0xff]   ;;  %v2762_v52 = vld [vmem:[#allocation7 + $0x328] ss:$16 sps:$4 sm:$0xff]  }
 0x17c   :  { %v798_v56 = vpack.c.bf16 %v794_v55, %v794_v55  ;;  %v2767_v53 = vld [vmem:[#allocation7 + $0x344] ss:$16 sps:$4 sm:$0xff]   ;;  %v2770_v54 = vld [vmem:[#allocation7 + $0x34c] ss:$16 sps:$4 sm:$0xff]   ;;  %v2771_v28 = vld [vmem:[#allocation7 + $0x360] ss:$16 sps:$4 sm:$0xff]  }
 0x17d   :  { %v792_v19 = vsel %vm784_vm5, %v2245_v13, %v772_v16  ;;  %v2457_v55 = vadd.f32 %v3076_v59, %v180_v50  ;;  %v2779_v63 = vld [vmem:[#allocation7 + $0x384] ss:$16 sps:$4 sm:$0xff]   ;;  %v2782_v0 = vld [vmem:[#allocation7 + $0x38c] ss:$16 sps:$4 sm:$0xff]   ;;  %v2777_v59 = vld [vmem:[#allocation7 + $0x380] ss:$16 sps:$4 sm:$0xff]  }
 0x17e   :  { %1623 = vmatprep.mubr.bf16.mxu0 %v798_v56  ;;  %1705 = vmatprep.mubr.bf16.mxu1 %v798_v56  ;;  %v796_v22 = vsel %vm776_vm6, %v780_v15, %v792_v19  ;;  %v2765_v56 = vld [vmem:[#allocation7 + $0x340] ss:$16 sps:$4 sm:$0xff]   ;;  %v2780_v2 = vld [vmem:[#allocation7 + $0x388] ss:$16 sps:$4 sm:$0xff]   ;;  %v2791_v8 = vld [vmem:[#allocation7 + $0x3c4] ss:$16 sps:$4 sm:$0xff]  }
 0x17f   :  { %1624 = vmatmul.mubr.bf16.vlgmr.msra.gmra.mrb[4].mxu0 %v797_v60  ;;  %1706 = vmatmul.mubr.bf16.vlgmr.msra.gmra.mrb[4].mxu1 %v797_v60  ;;  %v800_v23 = vpack.c.bf16 %v796_v22, %v796_v22  ;;  %v2776_v60 = vld [vmem:[#allocation7 + $0x36c] ss:$16 sps:$4 sm:$0xff]   ;;  %v2789_v12 = vld [vmem:[#allocation7 + $0x3c0] ss:$16 sps:$4 sm:$0xff]   ;;  %v2792_v13 = vld [vmem:[#allocation7 + $0x3c8] ss:$16 sps:$4 sm:$0xff]  }
 0x180   :  { %1633 = vmatpush1.bf16.msra.mxu0 %v2705_v57  ;;  %1715 = vmatpush1.bf16.msra.mxu1 %v2708_v58  ;;  %v2768_v57 = vld [vmem:[#allocation7 + $0x348] ss:$16 sps:$4 sm:$0xff]   ;;  %v2773_v58 = vld [vmem:[#allocation7 + $0x364] ss:$16 sps:$4 sm:$0xff]   ;;  %vm783_vm7 = vcmp.ge.f32.partialorder %v2457_v55, 1.0  ;;  %vm775_vm8 = vcmp.le.f32.partialorder %v2457_v55, -1.0 }
 0x181   :  { %1634 = vmatprep.subr.bf16.mxu0 %v2713_v61  ;;  %1716 = vmatprep.subr.bf16.mxu1 %v2716_v62  ;;  %v759_v61 = vmul.f32 %v2457_v55, %v2457_v55  ;;  %v2774_v62 = vld [vmem:[#allocation7 + $0x368] ss:$16 sps:$4 sm:$0xff]   ;;  %v2800_v15 = vld [vmem:[#allocation7 + $0x3ec] ss:$16 sps:$4 sm:$0xff]   ;;  %v779_v16 = vadd.f32 0.33333334, %v2457_v55 }
 0x182   :  { %1664 = vmatprep.mubr.bf16.mxu0 %v800_v23  ;;  %1746 = vmatprep.mubr.bf16.mxu1 %v800_v23  ;;  %v2798_v19 = vld [vmem:[#allocation7 + $0x3e8] ss:$16 sps:$4 sm:$0xff]   ;;  %v2803_v23 = vld [vmem:[#allocation8] sm:$0xff]  }
 0x183   :  { %v763_v1 = vadd.f32 3.0, %v759_v61  ;;  %v2823_v50 = vld [vmem:[#allocation8 + $0x28] sm:$0xff]  }
 0x184   :  { %1635 = vmatpush1.bf16.msra.mxu0 %v2711_v3  ;;  %1717 = vmatpush1.bf16.msra.mxu1 %v2714_v4  ;;  %v2785_v3 = vld [vmem:[#allocation7 + $0x3a4] ss:$16 sps:$4 sm:$0xff]   ;;  %v2788_v4 = vld [vmem:[#allocation7 + $0x3ac] ss:$16 sps:$4 sm:$0xff]   ;;  %v929_v61 = vld [vmem:[%s3117_s4] sm:$0xf] }
 0x185   :  { %1636 = vmatprep.subr.bf16.mxu0 %v2719_v6  ;;  %1718 = vmatprep.subr.bf16.mxu1 %v2722_v7  ;;  %v767_v5 = vmul.f32 %v2457_v55, %v763_v1  ;;  %v2783_v6 = vld [vmem:[#allocation7 + $0x3a0] ss:$16 sps:$4 sm:$0xff]   ;;  %v2786_v7 = vld [vmem:[#allocation7 + $0x3a8] ss:$16 sps:$4 sm:$0xff]  }
 0x188   :  { %1637 = vmatpush1.bf16.msra.mxu0 %v2717_v9  ;;  %1719 = vmatpush1.bf16.msra.mxu1 %v2720_v10  ;;  %v2794_v9 = vld [vmem:[#allocation7 + $0x3cc] ss:$16 sps:$4 sm:$0xff]   ;;  %v771_v10 = vmul.f32 0.16666667, %v767_v5 }
 0x189   :  { %1638 = vmatprep.subr.bf16.mxu0 %v2725_v11  ;;  %1720 = vmatprep.subr.bf16.mxu1 %v2728_v14  ;;  %v2244_v11 = vadd.f32 -0.33333334, %v2457_v55  ;;  %v2797_v14 = vld [vmem:[#allocation7 + $0x3e4] ss:$16 sps:$4 sm:$0xff]  }
 0x18a   :  { %v2828_v55 = vld [vmem:[#allocation8 + $0xb0] sm:$0xff]  }
 0x18c   :  { %1639 = vmatpush1.bf16.msra.mxu0 %v2723_v17  ;;  %1721 = vmatpush1.bf16.msra.mxu1 %v2726_v18  ;;  %v791_v17 = vsel %vm783_vm7, %v2244_v11, %v771_v10  ;;  %v2795_v18 = vld [vmem:[#allocation7 + $0x3e0] ss:$16 sps:$4 sm:$0xff]  }
 0x18d   :  { %1640 = vmatprep.subr.bf16.mxu0 %v2731_v20  ;;  %1722 = vmatprep.subr.bf16.mxu1 %v2734_v21  ;;  %v2801_v20 = vld [vmem:[#allocation8 + $0x40] sm:$0xff]   ;;  %v795_v22 = vsel %vm775_vm8, %v779_v16, %v791_v17 }
 0x18e   :  { %v2802_v21 = vld [vmem:[#allocation8 + $0xc0] sm:$0xff]  }
 0x190   :  { %1641 = vmatpush1.bf16.msra.mxu0 %v2729_v24  ;;  %1723 = vmatpush1.bf16.msra.mxu1 %v2732_v25  ;;  %v2804_v24 = vld [vmem:[#allocation8 + $0x80] sm:$0xff]   ;;  %v799_v25 = vpack.c.bf16 %v795_v22, %v795_v22 }
 0x191   :  { %1642 = vmatprep.subr.bf16.mxu0 %v2737_v30  ;;  %1724 = vmatprep.subr.bf16.mxu1 %v2740_v31  ;;  %v2805_v30 = vld [vmem:[#allocation8 + $0x48] sm:$0xff]  }
 0x192   :  { %v2806_v31 = vld [vmem:[#allocation8 + $0xc8] sm:$0xff]  }
 0x194   :  { %1643 = vmatpush1.bf16.msra.mxu0 %v2735_v32  ;;  %1725 = vmatpush1.bf16.msra.mxu1 %v2738_v33  ;;  %v2807_v32 = vld [vmem:[#allocation8 + $0x8] sm:$0xff]  }
 0x195   :  { %1644 = vmatprep.subr.bf16.mxu0 %v2743_v34  ;;  %1726 = vmatprep.subr.bf16.mxu1 %v2746_v35  ;;  %v2808_v33 = vld [vmem:[#allocation8 + $0x88] sm:$0xff]   ;;  %v2809_v34 = vld [vmem:[#allocation8 + $0x50] sm:$0xff]  }
 0x196   :  { %v2810_v35 = vld [vmem:[#allocation8 + $0xd0] sm:$0xff]  }
 0x198   :  { %1645 = vmatpush1.bf16.msra.mxu0 %v2741_v36  ;;  %1727 = vmatpush1.bf16.msra.mxu1 %v2744_v37  ;;  %v2811_v36 = vld [vmem:[#allocation8 + $0x10] sm:$0xff]  }
 0x199   :  { %1646 = vmatprep.subr.bf16.mxu0 %v2749_v38  ;;  %1728 = vmatprep.subr.bf16.mxu1 %v2752_v39  ;;  %v2812_v37 = vld [vmem:[#allocation8 + $0x90] sm:$0xff]   ;;  %v2813_v38 = vld [vmem:[#allocation8 + $0x58] sm:$0xff]  }
 0x19a   :  { %v2814_v39 = vld [vmem:[#allocation8 + $0xd8] sm:$0xff]  }
 0x19c   :  { %1647 = vmatpush1.bf16.msra.mxu0 %v2747_v40  ;;  %1729 = vmatpush1.bf16.msra.mxu1 %v2750_v41  ;;  %v2815_v40 = vld [vmem:[#allocation8 + $0x18] sm:$0xff]  }
 0x19d   :  { %1648 = vmatprep.subr.bf16.mxu0 %v2755_v42  ;;  %1730 = vmatprep.subr.bf16.mxu1 %v2758_v43  ;;  %v2816_v41 = vld [vmem:[#allocation8 + $0x98] sm:$0xff]   ;;  %v2817_v42 = vld [vmem:[#allocation8 + $0x60] sm:$0xff]  }
 0x19e   :  { %v2818_v43 = vld [vmem:[#allocation8 + $0xe0] sm:$0xff]  }
 0x1a0   :  { %1649 = vmatpush1.bf16.msra.mxu0 %v2753_v46  ;;  %1731 = vmatpush1.bf16.msra.mxu1 %v2756_v47  ;;  %v2819_v46 = vld [vmem:[#allocation8 + $0x20] sm:$0xff]  }
 0x1a1   :  { %1650 = vmatprep.subr.bf16.mxu0 %v2761_v48  ;;  %1732 = vmatprep.subr.bf16.mxu1 %v2764_v49  ;;  %v2820_v47 = vld [vmem:[#allocation8 + $0xa0] sm:$0xff]   ;;  %v2821_v48 = vld [vmem:[#allocation8 + $0x68] sm:$0xff]  }
 0x1a2   :  { %v2822_v49 = vld [vmem:[#allocation8 + $0xe8] sm:$0xff]  }
 0x1a4   :  { %1651 = vmatpush1.bf16.msra.mxu0 %v2759_v51  ;;  %1733 = vmatpush1.bf16.msra.mxu1 %v2762_v52  ;;  %v2824_v51 = vld [vmem:[#allocation8 + $0xa8] sm:$0xff]   ;;  %v2825_v52 = vld [vmem:[#allocation8 + $0x70] sm:$0xff]  }
 0x1a5   :  { %1652 = vmatprep.subr.bf16.mxu0 %v2767_v53  ;;  %1734 = vmatprep.subr.bf16.mxu1 %v2770_v54  ;;  %v2826_v53 = vld [vmem:[#allocation8 + $0xf0] sm:$0xff]  }
 0x1a6   :  { %v2827_v54 = vld [vmem:[#allocation8 + $0x30] sm:$0xff]  }
 0x1a8   :  { %1653 = vmatpush1.bf16.msra.mxu0 %v2765_v56  ;;  %1735 = vmatpush1.bf16.msra.mxu1 %v2768_v57  ;;  %v2829_v56 = vld [vmem:[#allocation8 + $0x78] sm:$0xff]  }
 0x1a9   :  { %1654 = vmatprep.subr.bf16.mxu0 %v2773_v58  ;;  %1736 = vmatprep.subr.bf16.mxu1 %v2776_v60  ;;  %v2830_v57 = vld [vmem:[#allocation8 + $0xf8] sm:$0xff]  }
 0x1aa   :  { %v2831_v58 = vld [vmem:[#allocation8 + $0x38] sm:$0xff]  }
 0x1ab   :  { %v2832_v60 = vld [vmem:[#allocation8 + $0xb8] sm:$0xff]  }
 0x1ac   :  { %1655 = vmatpush1.bf16.msra.mxu0 %v2771_v28  ;;  %1737 = vmatpush1.bf16.msra.mxu1 %v2774_v62  ;;  %v934_v28 = vrot.slane %v929_v61, %v171_v27  ;;  %v938_v62 = vrot.slane %v929_v61, %v175_v29 }
 0x1ad   :  { %1656 = vmatprep.subr.bf16.mxu0 %v2779_v63  ;;  %1738 = vmatprep.subr.bf16.mxu1 %v2782_v0  ;;  %v946_v63 = vrot.slane %v929_v61, %v183_v44  ;;  %v942_v0 = vrot.slane %v929_v61, %v179_v45 }
 0x1b0   :  { %1657 = vmatpush1.bf16.msra.mxu0 %v2777_v59  ;;  %1739 = vmatpush1.bf16.msra.mxu1 %v2780_v2 }
 0x1b1   :  { %1658 = vmatprep.subr.bf16.mxu0 %v2785_v3  ;;  %1740 = vmatprep.subr.bf16.mxu1 %v2788_v4 }
 0x1b4   :  { %1659 = vmatpush1.bf16.msra.mxu0 %v2783_v6  ;;  %1741 = vmatpush1.bf16.msra.mxu1 %v2786_v7 }
 0x1b5   :  { %1660 = vmatprep.subr.bf16.mxu0 %v2791_v8  ;;  %1742 = vmatprep.subr.bf16.mxu1 %v2794_v9 }
 0x1b8   :  { %1661 = vmatpush1.bf16.msra.mxu0 %v2789_v12  ;;  %1743 = vmatpush1.bf16.msra.mxu1 %v2792_v13 }
 0x1b9   :  { %1662 = vmatprep.subr.bf16.mxu0 %v2797_v14  ;;  %1744 = vmatprep.subr.bf16.mxu1 %v2800_v15 }
 0x1bc   :  { %1663 = vmatpush1.bf16.msra.mxu0 %v2795_v18  ;;  %1745 = vmatpush1.bf16.msra.mxu1 %v2798_v19 }
 0x1bd   :  { %2411 = vmatprep.subr.bf16.mxu0 %v2801_v20  ;;  %2433 = vmatprep.subr.bf16.mxu1 %v2802_v21 }
 0x1bf   :  { %1665 = vmatmul.mubr.bf16.vlgmr.msra.gmra.mrb[4].mxu0 %v799_v25  ;;  %1747 = vmatmul.mubr.bf16.vlgmr.msra.gmra.mrb[4].mxu1 %v799_v25 }
 0x1c0   :  { %2412 = vmatpush3.bf16.msra.mxu0 %v2803_v23  ;;  %2434 = vmatpush3.bf16.msra.mxu1 %v2804_v24 }
 0x1c1   :  { %2413 = vmatprep.subr.bf16.mxu0 %v2805_v30  ;;  %2435 = vmatprep.subr.bf16.mxu1 %v2806_v31 }
 0x1c4   :  { %2414 = vmatpush3.bf16.msra.mxu0 %v2807_v32  ;;  %2436 = vmatpush3.bf16.msra.mxu1 %v2808_v33 }
 0x1c5   :  { %2415 = vmatprep.subr.bf16.mxu0 %v2809_v34  ;;  %2437 = vmatprep.subr.bf16.mxu1 %v2810_v35 }
 0x1c8   :  { %2416 = vmatpush3.bf16.msra.mxu0 %v2811_v36  ;;  %2438 = vmatpush3.bf16.msra.mxu1 %v2812_v37 }
 0x1c9   :  { %2417 = vmatprep.subr.bf16.mxu0 %v2813_v38  ;;  %2439 = vmatprep.subr.bf16.mxu1 %v2814_v39 }
 0x1cc   :  { %2418 = vmatpush3.bf16.msra.mxu0 %v2815_v40  ;;  %2440 = vmatpush3.bf16.msra.mxu1 %v2816_v41 }
 0x1cd   :  { %2419 = vmatprep.subr.bf16.mxu0 %v2817_v42  ;;  %2441 = vmatprep.subr.bf16.mxu1 %v2818_v43 }
 0x1d0   :  { %2420 = vmatpush3.bf16.msra.mxu0 %v2819_v46  ;;  %2442 = vmatpush3.bf16.msra.mxu1 %v2820_v47 }
 0x1d1   :  { %2421 = vmatprep.subr.bf16.mxu0 %v2821_v48  ;;  %2443 = vmatprep.subr.bf16.mxu1 %v2822_v49 }
 0x1d4   :  { %2422 = vmatpush3.bf16.msra.mxu0 %v2823_v50  ;;  %2444 = vmatpush3.bf16.msra.mxu1 %v2824_v51  ;;  %v2378_v50 = vld [vmem:[%s3119_s6] ss:$0 sm:$0xff] }
 0x1d5   :  { %2423 = vmatprep.subr.bf16.mxu0 %v2825_v52  ;;  %2445 = vmatprep.subr.bf16.mxu1 %v2826_v53 }
 0x1d8   :  { %2424 = vmatpush3.bf16.msra.mxu0 %v2827_v54  ;;  %2446 = vmatpush3.bf16.msra.mxu1 %v2828_v55 }
 0x1d9   :  { %2425 = vmatprep.subr.bf16.mxu0 %v2829_v56  ;;  %2447 = vmatprep.subr.bf16.mxu1 %v2830_v57 }
 0x1dc   :  { %2426 = vmatpush3.bf16.msra.mxu0 %v2831_v58  ;;  %2448 = vmatpush3.bf16.msra.mxu1 %v2832_v60 }
 0x292   :  { %v1666_v1 = vpop.f32.mrb[4].mxu0  ;;  %v1748_v59 = vpop.f32.mrb[4].mxu1 }
 0x293   :  { %v2459_v2 = vadd.f32 %v1666_v1, %v934_v28  ;;  %v1668_v3 = vpop.f32.mrb[5].mxu0  ;;  %v1750_v4 = vpop.f32.mrb[5].mxu1  ;;  %v2461_v9 = vadd.f32 %v1748_v59, %v942_v0 }
 0x294   :  { %v2460_v5 = vadd.f32 %v1668_v3, %v938_v62  ;;  %v2462_v6 = vadd.f32 %v1750_v4, %v946_v63  ;;  %v1670_v7 = vpop.f32.mrb[6].mxu0  ;;  %v1752_v8 = vpop.f32.mrb[6].mxu1 }
 0x295   :  { %v1671_v27 = vpop.f32.mrb[7].mxu0  ;;  %v1753_v10 = vpop.f32.mrb[7].mxu1  ;;  %v1755_v11 = vmul.f32 %v2459_v2, %v2459_v2  ;;  %vm1771_vm9 = vcmp.le.f32.partialorder %v2459_v2, -1.0  ;;  %v1775_v26 = vadd.f32 0.33333334, %v2459_v2  ;;  %vm1779_vm11 = vcmp.ge.f32.partialorder %v2459_v2, 1.0 }
 0x296   :  { %v1756_v29 = vmul.f32 %v2460_v5, %v2460_v5  ;;  %v1758_v12 = vmul.f32 %v2462_v6, %v2462_v6  ;;  %vm1772_vm10 = vcmp.le.f32.partialorder %v2460_v5, -1.0  ;;  %v1757_v14 = vmul.f32 %v2461_v9, %v2461_v9 }
 0x297   :  { %v1759_v44 = vadd.f32 3.0, %v1755_v11  ;;  %v1776_v16 = vadd.f32 0.33333334, %v2460_v5  ;;  %vm1780_vm12 = vcmp.ge.f32.partialorder %v2460_v5, 1.0  ;;  %v2375_v18 = vadd.f32 -0.33333334, %v2460_v5 }
 0x298   :  { %v1760_v13 = vadd.f32 3.0, %v1756_v29  ;;  %v1762_v45 = vadd.f32 3.0, %v1758_v12  ;;  %vm1774_vm13 = vcmp.le.f32.partialorder %v2462_v6, -1.0  ;;  %v1761_v20 = vadd.f32 3.0, %v1757_v14 }
 0x299   :  { %v1763_v17 = vmul.f32 %v2459_v2, %v1759_v44  ;;  %v2374_v23 = vadd.f32 -0.33333334, %v2459_v2  ;;  %v1778_v25 = vadd.f32 0.33333334, %v2462_v6  ;;  %v2377_v30 = vadd.f32 -0.33333334, %v2462_v6 }
 0x29a   :  { %v1764_v15 = vmul.f32 %v2460_v5, %v1760_v13  ;;  %v1766_v19 = vmul.f32 %v2462_v6, %v1762_v45  ;;  %v1765_v31 = vmul.f32 %v2461_v9, %v1761_v20  ;;  %vm1782_vm14 = vcmp.ge.f32.partialorder %v2462_v6, 1.0 }
 0x29b   :  { %v1767_v22 = vmul.f32 0.16666667, %v1763_v17  ;;  %v2376_v34 = vadd.f32 -0.33333334, %v2461_v9  ;;  %v1777_v41 = vadd.f32 0.33333334, %v2461_v9 }
 0x29c   :  { %v1768_v21 = vmul.f32 0.16666667, %v1764_v15  ;;  %v1770_v24 = vmul.f32 0.16666667, %v1766_v19  ;;  %v1769_v38 = vmul.f32 0.16666667, %v1765_v31 }
 0x29d   :  { %v1787_v33 = vsel %vm1779_vm11, %v2374_v23, %v1767_v22  ;;  %vm1781_vm15 = vcmp.ge.f32.partialorder %v2461_v9, 1.0  ;;  %vm1773_vm0 = vcmp.le.f32.partialorder %v2461_v9, -1.0 }
 0x29e   :  { %v1788_v32 = vsel %vm1780_vm12, %v2375_v18, %v1768_v21  ;;  %v1790_v36 = vsel %vm1782_vm14, %v2377_v30, %v1770_v24  ;;  %v1791_v37 = vsel %vm1771_vm9, %v1775_v26, %v1787_v33  ;;  %v1789_v46 = vsel %vm1781_vm15, %v2376_v34, %v1769_v38 }
 0x29f   :  { %v1792_v35 = vsel %vm1772_vm10, %v1776_v16, %v1788_v32  ;;  %v1794_v40 = vsel %vm1774_vm13, %v1778_v25, %v1790_v36  ;;  %v1795_v43 = vpack.c.bf16 %v1791_v37, %v1791_v37  ;;  %v1793_v47 = vsel %vm1773_vm0, %v1777_v41, %v1789_v46 }
 0x2a0   :  { %v1796_v39 = vpack.c.bf16 %v1792_v35, %v1792_v35  ;;  %v1798_v42 = vpack.c.bf16 %v1794_v40, %v1794_v40  ;;  %v1797_v48 = vpack.c.bf16 %v1793_v47, %v1793_v47 }
 0x2a2   :  { %2094 = vmatprep.mubr.bf16.mxu0 %v1796_v39  ;;  %2134 = vmatprep.mubr.bf16.mxu1 %v1798_v42 }
 0x2a3   :  { %2095 = vmatmul.mubr.bf16.vlgmr.msra.gmra.mrb[8].mxu0 %v1795_v43  ;;  %2135 = vmatmul.mubr.bf16.vlgmr.msra.gmra.mrb[8].mxu1 %v1797_v48 }
 0x376   :  { %v2427_v49 = vpop.f32.mrb[8].mxu0  ;;  %v2449_v52 = vpop.f32.mrb[8].mxu1 }
 0x377   :  { %v2428_v51 = vpop.f32.mrb[9].mxu0  ;;  %v2450_v55 = vpop.f32.mrb[9].mxu1 }
 0x378   :  { %v2429_v53 = vadd.f32 %v2428_v51, %v2427_v49  ;;  %v2430_v54 = vpop.f32.mrb[10].mxu0  ;;  %v2451_v58 = vadd.f32 %v2450_v55, %v2449_v52  ;;  %v2452_v60 = vpop.f32.mrb[10].mxu1 }
 0x379   :  { %v2431_v56 = vpop.f32.mrb[11].mxu0  ;;  %v2453_v61 = vpop.f32.mrb[11].mxu1 }
 0x37a   :  { %v2097_v57 = vadd.f32 %v2429_v53, %v2378_v50 }
 0x37c   :  { %v2137_v28 = vadd.f32 %v2451_v58, %v2097_v57 }
 0x37e   :  { %2142 = vst [vmem:[#allocation10] sm:$0xff] %v2137_v28 }
 0x37f   :  { %2932 = shalt.err (!%p2929_p8)
}
 0x380   :  { %s2933_s10 = scalar_lea.hbm %s3120_s7, 128 }
 0x381   :  { %p2934_p9 = scmp.ne.s32.totalorder %s3120_s7, %s2933_s10  ;;  %p2937_p10 = scmp.lt.u32.totalorder %s2933_s10, %s3120_s7 }
 0x383   :  { %p2939_p11 = pnand %p2937_p10, %p2934_p9 }
 0x385   :  { %2942 = shalt.err (!%p2939_p11)
}
 0x386   :  { %2152 = dma.vmem_to_hbm [thread:$0]  %s2150_s30, 128, %s3120_s7, [#allocation4]  }
 0x387   :  { %2949 = dma.done.wait [#allocation4], 128  }
 0x388   :  { %2950 = vsyncadd [#allocation4], 4294967168 }
 0x389   :  { %2156 = vsyncpa [#allocation3], 1 }
 0x38a   :  { %2157 = vsyncpa [#allocation6], 1 }
 0x38b   :  { %2158 = vsyncpa [#allocation9], 1 }
 0x38c   :  { %2159 = vsyncpa [#allocation4], 1 }

</bundles_post_ra>
